<compile_context>
chip_gen: v6e
topology: v6e:2x2x1
jax: 0.10.0
libtpu: 0.0.40
codegen_flags: <defaults>
</compile_context>

<pallas_src>
import functools

import jax
import jax.numpy as jnp
from jax import lax
from jax.experimental import pallas as pl
from jax.experimental.pallas import tpu as pltpu

# ----- model hyper-parameters (TinvSOS(n_blocks, input_size, hidden_size, k, r)) -----
N_BLOCKS = 2
INPUT_SIZE = 8     # D  (dimension of latent vector z)
HIDDEN_SIZE = 32   # H  (hidden width of MADE conditioner)
K = 5              # number of squared polynomials
R = 4              # polynomial degree
M = R + 1          # number of coefficients per polynomial
BN_EPS = 1e-5


# ---------------------------------------------------------------------------
# Pallas kernel: all flow blocks fused, one grid step per block.
# Layout: feature-major, activations (features, batch).
# ---------------------------------------------------------------------------
def _fused_flow_kernel(z_ref, w1_ref, b1_ref, w2_ref, b2_ref, w3_ref, b3_ref,
                       const_ref, lg_ref, bt_ref,
                       s_ref, ld_ref,
                       h_c, ld_c, *, D, K, M, eps):
    i = pl.program_id(0)
    n = pl.num_programs(0)

    # ---- initialize the carried state on the first block ----
    @pl.when(i == 0)
    def _init():
        h_c[...] = z_ref[...].astype(jnp.float32)
        ld_c[...] = jnp.zeros_like(ld_c)

    h = h_c[...]                                                       # (D, B)

    # ---- SOSFlow conditioner: 3-layer masked (MADE) MLP on the MXU ----
    # Weights are (out, in); biases are column vectors broadcast over lanes.
    h1 = jnp.tanh(jnp.dot(w1_ref[...], h,
                          preferred_element_type=jnp.float32) + b1_ref[...])   # (H, B)
    h2 = jnp.tanh(jnp.dot(w2_ref[...], h1,
                          preferred_element_type=jnp.float32) + b2_ref[...])   # (H, B)
    a = jnp.dot(w3_ref[...], h2,
                preferred_element_type=jnp.float32) + b3_ref[...]              # (K*M*D, B)

    # ---- SOS polynomial transform ----
    powers = [jnp.ones_like(h)]                    # h^0 .. h^{M-1}
    for _ in range(1, M):
        powers.append(powers[-1] * h)

    deriv = jnp.zeros_like(h)                      # sum_k (sum_p a_p h^p)^2 > 0
    quad = jnp.zeros_like(h)                       # sum_k sum_{p,q} a_p a_q h^{p+q}/(p+q+1)
    for kap in range(K):
        base = kap * M * D
        # sublane-aligned coefficient slabs (offsets are multiples of D=8)
        terms = [a[base + p * D: base + (p + 1) * D, :] * powers[p] for p in range(M)]
        poly = terms[0]
        for p in range(1, M):
            poly = poly + terms[p]
        deriv = deriv + poly * poly
        # symmetric quadrature: p==q once, p<q twice
        for p in range(M):
            quad = quad + (terms[p] * terms[p]) * (1.0 / float(2 * p + 1))
            for q in range(p + 1, M):
                quad = quad + (terms[p] * terms[q]) * (2.0 / float(p + q + 1))

    z_sos = const_ref[...] + h * quad                                   # (D, B)
    ld_sos = jnp.sum(jnp.log(deriv), axis=0, keepdims=True)             # (1, B) lane-dense

    # ---- BatchNormFlow (training-mode batch statistics) ----
    # TODO(synk): running_mean / running_var buffer updates (a stateful training
    # side effect of BatchNormFlow) are not materialized by this stateless kernel.
    mean = jnp.mean(z_sos, axis=1, keepdims=True)                       # (D, 1)
    diff = z_sos - mean
    var = jnp.mean(diff * diff, axis=1, keepdims=True) + eps            # (D, 1)
    y = jnp.exp(lg_ref[...]) * (diff * lax.rsqrt(var)) + bt_ref[...]    # (D, B)
    ld_bn = jnp.sum(lg_ref[...] - 0.5 * jnp.log(var))                   # scalar

    # ---- Reverse: folded into the (pre-permuted) weights of the next block ----
    h_c[...] = y
    ld_c[...] = ld_c[...] + ld_sos + ld_bn

    # ---- write outputs once, at the last block ----
    @pl.when(i == n - 1)
    def _write():
        s_ref[...] = h_c[...]
        ld_ref[...] = ld_c[...]


def _param_spec(shape):
    """Stacked per-block parameter (N, r, c): block i sees a squeezed (r, c) tile."""
    r, c = shape[1], shape[2]
    return pl.BlockSpec((None, r, c), lambda i: (i, 0, 0))


# ---------------------------------------------------------------------------
# TinvSOS forward: z.view(-1, input_size) -> fused FlowSequential of N_BLOCKS blocks
# ---------------------------------------------------------------------------
def tinv_sos_forward(z, stacked):
    h = z.reshape(-1, INPUT_SIZE).astype(jnp.float32)
    B, D = h.shape
    zT = h.T                                                            # (D, B) feature-major

    args = (zT, stacked['w1'], stacked['b1'], stacked['w2'], stacked['b2'],
            stacked['w3'], stacked['b3'], stacked['const'],
            stacked['log_gamma'], stacked['beta'])
    in_specs = [pl.BlockSpec((D, B), lambda i: (0, 0))] + \
               [_param_spec(a.shape) for a in args[1:]]

    kernel = functools.partial(_fused_flow_kernel, D=D, K=K, M=M, eps=BN_EPS)
    sT, ldT = pl.pallas_call(
        kernel,
        grid=(N_BLOCKS,),
        in_specs=in_specs,
        out_specs=(pl.BlockSpec((D, B), lambda i: (0, 0)),
                   pl.BlockSpec((1, B), lambda i: (0, 0))),
        out_shape=(jax.ShapeDtypeStruct((D, B), jnp.float32),
                   jax.ShapeDtypeStruct((1, B), jnp.float32)),
        scratch_shapes=[pltpu.VMEM((D, B), jnp.float32),
                        pltpu.VMEM((1, B), jnp.float32)],
        compiler_params=pltpu.CompilerParams(dimension_semantics=("arbitrary",)),
    )(*args)

    s = sT.T                                                            # (B, D)
    if N_BLOCKS % 2 == 1:
        s = s[:, ::-1]   # one pending Reverse left when the block count is odd
    return s, ldT.T                                                     # (B, D), (B, 1)


# ---------------------------------------------------------------------------
# Parameter construction (deterministic, synthetic; MADE masks + linear layers)
# ---------------------------------------------------------------------------
def make_mask(in_f, out_f, n_flow, mask_type=None):
    if mask_type == 'input':
        in_deg = jnp.arange(in_f) % n_flow
    else:
        in_deg = jnp.arange(in_f) % (n_flow - 1)
    if mask_type == 'output':
        out_deg = jnp.arange(out_f) % n_flow - 1
    else:
        out_deg = jnp.arange(out_f) % (n_flow - 1)
    return (out_deg[:, None] >= in_deg[None, :]).astype(jnp.float32)     # (out, in)


def init_block_params(key, D, H, K_, M_):
    ks = jax.random.split(key, 7)
    m1 = make_mask(D, H, D, 'input')               # (H, D)
    m2 = make_mask(H, H, D)                        # (H, H)
    m3 = make_mask(H, K_ * M_ * D, D, 'output')    # (K*M*D, H), out idx = (k*M+p)*D+dim
    w1 = jax.random.normal(ks[0], (H, D)) / jnp.sqrt(D)
    b1 = 0.1 * jax.random.normal(ks[1], (H,))
    w2 = jax.random.normal(ks[2], (H, H)) / jnp.sqrt(H)
    b2 = 0.1 * jax.random.normal(ks[3], (H,))
    w3 = jax.random.normal(ks[4], (K_ * M_ * D, H)) / jnp.sqrt(H)
    b3 = 0.1 * jax.random.normal(ks[5], (K_ * M_ * D,))
    const = jax.random.normal(ks[6], (1, 1))
    f32 = lambda x: x.astype(jnp.float32)
    return {
        'w1m': f32(w1 * m1), 'b1': f32(b1.reshape(H, 1)),
        'w2m': f32(w2 * m2), 'b2': f32(b2.reshape(H, 1)),
        'w3m': f32(w3 * m3), 'b3': f32(b3.reshape(K_ * M_ * D, 1)),
        'const': f32(const),                               # (1, 1)
        'log_gamma': jnp.zeros((D, 1), jnp.float32),       # BatchNormFlow init
        'beta': jnp.zeros((D, 1), jnp.float32),
    }


def stack_block_params(blocks):
    """Stack per-block params; fold the preceding Reverse into odd-indexed blocks."""
    D, H = INPUT_SIZE, HIDDEN_SIZE
    cols = {k: [] for k in ('w1', 'b1', 'w2', 'b2', 'w3', 'b3',
                            'const', 'log_gamma', 'beta')}
    for i, p in enumerate(blocks):
        w1, b1 = p['w1m'], p['b1']
        w2, b2 = p['w2m'], p['b2']
        w3, b3 = p['w3m'], p['b3']
        lg, bt = p['log_gamma'], p['beta']
        if i % 2 == 1:
            # previous Reverse folded in: permute per-dimension quantities.
            w1 = w1[:, ::-1]                                            # input columns
            w3 = w3.reshape(K * M, D, H)[:, ::-1, :].reshape(K * M * D, H)
            b3 = b3.reshape(K * M, D, 1)[:, ::-1, :].reshape(K * M * D, 1)
            lg = lg[::-1]
            bt = bt[::-1]
        for k, v in (('w1', w1), ('b1', b1), ('w2', w2), ('b2', b2),
                     ('w3', w3), ('b3', b3), ('const', p['const']),
                     ('log_gamma', lg), ('beta', bt)):
            cols[k].append(v)
    return {k: jnp.stack(v) for k, v in cols.items()}


# ---------------------------------------------------------------------------
# Pure-JAX reference (same math, explicit Reverse) for a sanity check
# ---------------------------------------------------------------------------
def reference_forward(z, blocks):
    h = z.reshape(-1, INPUT_SIZE).astype(jnp.float32)
    logdet = jnp.zeros((h.shape[0], 1), jnp.float32)
    filt = 1.0 / (jnp.arange(M)[:, None] + jnp.arange(M)[None, :] + 1.0)
    for p in blocks:
        h1 = jnp.tanh(h @ p['w1m'].T + p['b1'].T)
        h2 = jnp.tanh(h1 @ p['w2m'].T + p['b2'].T)
        a = (h2 @ p['w3m'].T + p['b3'].T).reshape(h.shape[0], K, M, INPUT_SIZE)
        powers = [jnp.ones_like(h)]
        for _ in range(1, M):
            powers.append(powers[-1] * h)
        X = jnp.stack(powers, axis=1)                       # (B, M, D)
        terms = a * X[:, None, :, :]                        # (B, K, M, D)
        poly = terms.sum(axis=2)                            # (B, K, D)
        deriv = (poly * poly).sum(axis=1)                   # (B, D)
        quad = jnp.einsum('bkpd,bkqd,pq->bd', terms, terms, filt)
        z_sos = p['const'] + h * quad
        ld_sos = jnp.log(deriv).sum(axis=1, keepdims=True)
        mean = z_sos.mean(0, keepdims=True)
        var = ((z_sos - mean) ** 2).mean(0, keepdims=True) + BN_EPS
        y = jnp.exp(p['log_gamma'].T) * (z_sos - mean) / jnp.sqrt(var) + p['beta'].T
        ld_bn = jnp.sum(p['log_gamma'].T - 0.5 * jnp.log(var))
        h = y[:, ::-1]
        logdet = logdet + ld_sos + ld_bn
    return h, logdet


if __name__ == "__main__":
    key = jax.random.PRNGKey(0)
    kz, kp = jax.random.split(key)
    # z: batch of latent vectors (e.g. image encodings); forward does z.view(-1, input_size)
    z = jax.random.normal(kz, (2, 4, INPUT_SIZE), jnp.float32)
    blocks = [init_block_params(k, INPUT_SIZE, HIDDEN_SIZE, K, M)
              for k in jax.random.split(kp, N_BLOCKS)]
    stacked = stack_block_params(blocks)

    fwd = jax.jit(tinv_sos_forward)
    s, log_jacob_T_inv = fwd(z, stacked)
    jax.block_until_ready((s, log_jacob_T_inv))

    s_ref, ld_ref = reference_forward(z, blocks)
    assert s.shape == (8, INPUT_SIZE) and log_jacob_T_inv.shape == (8, 1)
    assert jnp.allclose(s, s_ref, rtol=1e-2, atol=1e-2)
    assert jnp.allclose(log_jacob_T_inv, ld_ref, rtol=1e-2, atol=1e-2)
    print("KERNEL_OK")
</pallas_src>

<mosaic_0001>
module attributes {stable_mosaic.version = 11 : i64} {
  func.func @_fused_flow_kernel(%arg0: i32, %arg1: memref<8x8xf32, #tpu.memory_space<vmem>>, %arg2: memref<1x32x8xf32, #tpu.memory_space<vmem>>, %arg3: memref<1x32x1xf32, #tpu.memory_space<vmem>>, %arg4: memref<1x32x32xf32, #tpu.memory_space<vmem>>, %arg5: memref<1x32x1xf32, #tpu.memory_space<vmem>>, %arg6: memref<1x200x32xf32, #tpu.memory_space<vmem>>, %arg7: memref<1x200x1xf32, #tpu.memory_space<vmem>>, %arg8: memref<1x1x1xf32, #tpu.memory_space<vmem>>, %arg9: memref<1x8x1xf32, #tpu.memory_space<vmem>>, %arg10: memref<1x8x1xf32, #tpu.memory_space<vmem>>, %arg11: memref<8x8xf32, #tpu.memory_space<vmem>>, %arg12: memref<1x8xf32, #tpu.memory_space<vmem>>, %arg13: memref<8x8xf32, #tpu.memory_space<vmem>>, %arg14: memref<1x8xf32, #tpu.memory_space<vmem>>) attributes {dimension_semantics = [#tpu.dimension_semantics<arbitrary>], iteration_bounds = array<i64: 2>, scalar_prefetch = 0 : i64, scratch_operands = 2 : i64, tpu.core_type = #tpu.core_type<tc>, window_params = [{pipeline_mode = #tpu.pipeline_mode<synchronous>, transform_indices = @transform_0, window_bounds = array<i64: 8, 8>}, {transform_indices = @transform_1, window_bounds = array<i64: 1, 32, 8>}, {transform_indices = @transform_2, window_bounds = array<i64: 1, 32, 1>}, {transform_indices = @transform_3, window_bounds = array<i64: 1, 32, 32>}, {transform_indices = @transform_4, window_bounds = array<i64: 1, 32, 1>}, {transform_indices = @transform_5, window_bounds = array<i64: 1, 200, 32>}, {transform_indices = @transform_6, window_bounds = array<i64: 1, 200, 1>}, {transform_indices = @transform_7, window_bounds = array<i64: 1, 1, 1>}, {transform_indices = @transform_8, window_bounds = array<i64: 1, 8, 1>}, {transform_indices = @transform_9, window_bounds = array<i64: 1, 8, 1>}, {pipeline_mode = #tpu.pipeline_mode<synchronous>, transform_indices = @transform_10, window_bounds = array<i64: 8, 8>}, {pipeline_mode = #tpu.pipeline_mode<synchronous>, transform_indices = @transform_11, window_bounds = array<i64: 1, 8>}]} {
    %c0_i32 = arith.constant 0 : i32
    %0 = arith.cmpi eq, %arg0, %c0_i32 : i32
    %1 = arith.extui %0 : i1 to i32
    %c0_i32_0 = arith.constant 0 : i32
    %2 = arith.cmpi ne, %1, %c0_i32_0 : i32
    scf.if %2 {
      %c0_127 = arith.constant 0 : index
      %c0_128 = arith.constant 0 : index
      %466 = vector.load %arg1[%c0_127, %c0_128] : memref<8x8xf32, #tpu.memory_space<vmem>>, vector<8x8xf32>
      %c0_129 = arith.constant 0 : index
      %c0_130 = arith.constant 0 : index
      %467 = vector.load %arg13[%c0_129, %c0_130] : memref<8x8xf32, #tpu.memory_space<vmem>>, vector<8x8xf32>
      tpu.vector_store %arg13[%c0_129, %c0_130], %466 {strides = array<i32>} : memref<8x8xf32, #tpu.memory_space<vmem>>, vector<8x8xf32>,
      %cst_131 = arith.constant 0.000000e+00 : f32
      %468 = vector.broadcast %cst_131 : f32 to vector<1x8xf32>
      %c0_132 = arith.constant 0 : index
      %c0_133 = arith.constant 0 : index
      %469 = vector.load %arg14[%c0_132, %c0_133] : memref<1x8xf32, #tpu.memory_space<vmem>>, vector<1x8xf32>
      tpu.vector_store %arg14[%c0_132, %c0_133], %468 {strides = array<i32>} : memref<1x8xf32, #tpu.memory_space<vmem>>, vector<1x8xf32>,
    } else {
    }
    %c0 = arith.constant 0 : index
    %c0_1 = arith.constant 0 : index
    %3 = vector.load %arg13[%c0, %c0_1] : memref<8x8xf32, #tpu.memory_space<vmem>>, vector<8x8xf32>
    %c0_2 = arith.constant 0 : index
    %c0_3 = arith.constant 0 : index
    %c0_4 = arith.constant 0 : index
    %4 = vector.load %arg2[%c0_2, %c0_3, %c0_4] : memref<1x32x8xf32, #tpu.memory_space<vmem>>, vector<1x32x8xf32>
    %5 = vector.shape_cast %4 : vector<1x32x8xf32> to vector<32x8xf32>
    %cst = arith.constant dense<0.000000e+00> : vector<32x8xf32>
    %6 = tpu.matmul %5, %3, %cst {dimension_numbers = #tpu.dot_dimension_numbers<[1], [0], [0], [1], [0, 0, 1, 1], [], []>} : vector<32x8xf32>, vector<8x8xf32>, vector<32x8xf32> -> vector<32x8xf32>
    %c0_5 = arith.constant 0 : index
    %c0_6 = arith.constant 0 : index
    %c0_7 = arith.constant 0 : index
    %7 = vector.load %arg3[%c0_5, %c0_6, %c0_7] : memref<1x32x1xf32, #tpu.memory_space<vmem>>, vector<1x32x1xf32>
    %8 = vector.shape_cast %7 : vector<1x32x1xf32> to vector<32x1xf32>
    %9 = vector.broadcast %8 : vector<32x1xf32> to vector<32x8xf32>
    %10 = arith.addf %6, %9 : vector<32x8xf32>
    %11 = math.tanh %10 : vector<32x8xf32>
    %c0_8 = arith.constant 0 : index
    %c0_9 = arith.constant 0 : index
    %c0_10 = arith.constant 0 : index
    %12 = vector.load %arg4[%c0_8, %c0_9, %c0_10] : memref<1x32x32xf32, #tpu.memory_space<vmem>>, vector<1x32x32xf32>
    %13 = vector.shape_cast %12 : vector<1x32x32xf32> to vector<32x32xf32>
    %cst_11 = arith.constant dense<0.000000e+00> : vector<32x8xf32>
    %14 = tpu.matmul %13, %11, %cst_11 {dimension_numbers = #tpu.dot_dimension_numbers<[1], [0], [0], [1], [0, 0, 1, 1], [], []>} : vector<32x32xf32>, vector<32x8xf32>, vector<32x8xf32> -> vector<32x8xf32>
    %c0_12 = arith.constant 0 : index
    %c0_13 = arith.constant 0 : index
    %c0_14 = arith.constant 0 : index
    %15 = vector.load %arg5[%c0_12, %c0_13, %c0_14] : memref<1x32x1xf32, #tpu.memory_space<vmem>>, vector<1x32x1xf32>
    %16 = vector.shape_cast %15 : vector<1x32x1xf32> to vector<32x1xf32>
    %17 = vector.broadcast %16 : vector<32x1xf32> to vector<32x8xf32>
    %18 = arith.addf %14, %17 : vector<32x8xf32>
    %19 = math.tanh %18 : vector<32x8xf32>
    %c0_15 = arith.constant 0 : index
    %c0_16 = arith.constant 0 : index
    %c0_17 = arith.constant 0 : index
    %20 = vector.load %arg6[%c0_15, %c0_16, %c0_17] : memref<1x200x32xf32, #tpu.memory_space<vmem>>, vector<1x200x32xf32>
    %21 = vector.shape_cast %20 : vector<1x200x32xf32> to vector<200x32xf32>
    %cst_18 = arith.constant dense<0.000000e+00> : vector<200x8xf32>
    %22 = tpu.matmul %21, %19, %cst_18 {dimension_numbers = #tpu.dot_dimension_numbers<[1], [0], [0], [1], [0, 0, 1, 1], [], []>} : vector<200x32xf32>, vector<32x8xf32>, vector<200x8xf32> -> vector<200x8xf32>
    %c0_19 = arith.constant 0 : index
    %c0_20 = arith.constant 0 : index
    %c0_21 = arith.constant 0 : index
    %23 = vector.load %arg7[%c0_19, %c0_20, %c0_21] : memref<1x200x1xf32, #tpu.memory_space<vmem>>, vector<1x200x1xf32>
    %24 = vector.shape_cast %23 : vector<1x200x1xf32> to vector<200x1xf32>
    %25 = vector.broadcast %24 : vector<200x1xf32> to vector<200x8xf32>
    %26 = arith.addf %22, %25 : vector<200x8xf32>
    %cst_22 = arith.constant 1.000000e+00 : f32
    %27 = vector.broadcast %cst_22 : f32 to vector<8x8xf32>
    %28 = arith.mulf %27, %3 : vector<8x8xf32>
    %29 = arith.mulf %28, %3 : vector<8x8xf32>
    %30 = arith.mulf %29, %3 : vector<8x8xf32>
    %31 = arith.mulf %30, %3 : vector<8x8xf32>
    %cst_23 = arith.constant 0.000000e+00 : f32
    %32 = vector.broadcast %cst_23 : f32 to vector<8x8xf32>
    %cst_24 = arith.constant 0.000000e+00 : f32
    %33 = vector.broadcast %cst_24 : f32 to vector<8x8xf32>
    %34 = vector.extract_strided_slice %26 {offsets = [0, 0], sizes = [8, 8], strides = [1, 1]} : vector<200x8xf32> to vector<8x8xf32>
    %35 = arith.mulf %34, %27 : vector<8x8xf32>
    %36 = vector.extract_strided_slice %26 {offsets = [8, 0], sizes = [8, 8], strides = [1, 1]} : vector<200x8xf32> to vector<8x8xf32>
    %37 = arith.mulf %36, %28 : vector<8x8xf32>
    %38 = vector.extract_strided_slice %26 {offsets = [16, 0], sizes = [8, 8], strides = [1, 1]} : vector<200x8xf32> to vector<8x8xf32>
    %39 = arith.mulf %38, %29 : vector<8x8xf32>
    %40 = vector.extract_strided_slice %26 {offsets = [24, 0], sizes = [8, 8], strides = [1, 1]} : vector<200x8xf32> to vector<8x8xf32>
    %41 = arith.mulf %40, %30 : vector<8x8xf32>
    %42 = vector.extract_strided_slice %26 {offsets = [32, 0], sizes = [8, 8], strides = [1, 1]} : vector<200x8xf32> to vector<8x8xf32>
    %43 = arith.mulf %42, %31 : vector<8x8xf32>
    %44 = arith.addf %35, %37 : vector<8x8xf32>
    %45 = arith.addf %44, %39 : vector<8x8xf32>
    %46 = arith.addf %45, %41 : vector<8x8xf32>
    %47 = arith.addf %46, %43 : vector<8x8xf32>
    %48 = arith.mulf %47, %47 : vector<8x8xf32>
    %49 = arith.addf %32, %48 : vector<8x8xf32>
    %50 = arith.mulf %35, %35 : vector<8x8xf32>
    %cst_25 = arith.constant 1.000000e+00 : f32
    %51 = vector.broadcast %cst_25 : f32 to vector<8x8xf32>
    %52 = arith.mulf %50, %51 : vector<8x8xf32>
    %53 = arith.addf %33, %52 : vector<8x8xf32>
    %54 = arith.mulf %35, %37 : vector<8x8xf32>
    %cst_26 = arith.constant 1.000000e+00 : f32
    %55 = vector.broadcast %cst_26 : f32 to vector<8x8xf32>
    %56 = arith.mulf %54, %55 : vector<8x8xf32>
    %57 = arith.addf %53, %56 : vector<8x8xf32>
    %58 = arith.mulf %35, %39 : vector<8x8xf32>
    %cst_27 = arith.constant 0.666666686 : f32
    %59 = vector.broadcast %cst_27 : f32 to vector<8x8xf32>
    %60 = arith.mulf %58, %59 : vector<8x8xf32>
    %61 = arith.addf %57, %60 : vector<8x8xf32>
    %62 = arith.mulf %35, %41 : vector<8x8xf32>
    %cst_28 = arith.constant 5.000000e-01 : f32
    %63 = vector.broadcast %cst_28 : f32 to vector<8x8xf32>
    %64 = arith.mulf %62, %63 : vector<8x8xf32>
    %65 = arith.addf %61, %64 : vector<8x8xf32>
    %66 = arith.mulf %35, %43 : vector<8x8xf32>
    %cst_29 = arith.constant 4.000000e-01 : f32
    %67 = vector.broadcast %cst_29 : f32 to vector<8x8xf32>
    %68 = arith.mulf %66, %67 : vector<8x8xf32>
    %69 = arith.addf %65, %68 : vector<8x8xf32>
    %70 = arith.mulf %37, %37 : vector<8x8xf32>
    %cst_30 = arith.constant 0.333333343 : f32
    %71 = vector.broadcast %cst_30 : f32 to vector<8x8xf32>
    %72 = arith.mulf %70, %71 : vector<8x8xf32>
    %73 = arith.addf %69, %72 : vector<8x8xf32>
    %74 = arith.mulf %37, %39 : vector<8x8xf32>
    %cst_31 = arith.constant 5.000000e-01 : f32
    %75 = vector.broadcast %cst_31 : f32 to vector<8x8xf32>
    %76 = arith.mulf %74, %75 : vector<8x8xf32>
    %77 = arith.addf %73, %76 : vector<8x8xf32>
    %78 = arith.mulf %37, %41 : vector<8x8xf32>
    %cst_32 = arith.constant 4.000000e-01 : f32
    %79 = vector.broadcast %cst_32 : f32 to vector<8x8xf32>
    %80 = arith.mulf %78, %79 : vector<8x8xf32>
    %81 = arith.addf %77, %80 : vector<8x8xf32>
    %82 = arith.mulf %37, %43 : vector<8x8xf32>
    %cst_33 = arith.constant 0.333333343 : f32
    %83 = vector.broadcast %cst_33 : f32 to vector<8x8xf32>
    %84 = arith.mulf %82, %83 : vector<8x8xf32>
    %85 = arith.addf %81, %84 : vector<8x8xf32>
    %86 = arith.mulf %39, %39 : vector<8x8xf32>
    %cst_34 = arith.constant 2.000000e-01 : f32
    %87 = vector.broadcast %cst_34 : f32 to vector<8x8xf32>
    %88 = arith.mulf %86, %87 : vector<8x8xf32>
    %89 = arith.addf %85, %88 : vector<8x8xf32>
    %90 = arith.mulf %39, %41 : vector<8x8xf32>
    %cst_35 = arith.constant 0.333333343 : f32
    %91 = vector.broadcast %cst_35 : f32 to vector<8x8xf32>
    %92 = arith.mulf %90, %91 : vector<8x8xf32>
    %93 = arith.addf %89, %92 : vector<8x8xf32>
    %94 = arith.mulf %39, %43 : vector<8x8xf32>
    %cst_36 = arith.constant 0.285714298 : f32
    %95 = vector.broadcast %cst_36 : f32 to vector<8x8xf32>
    %96 = arith.mulf %94, %95 : vector<8x8xf32>
    %97 = arith.addf %93, %96 : vector<8x8xf32>
    %98 = arith.mulf %41, %41 : vector<8x8xf32>
    %cst_37 = arith.constant 0.142857149 : f32
    %99 = vector.broadcast %cst_37 : f32 to vector<8x8xf32>
    %100 = arith.mulf %98, %99 : vector<8x8xf32>
    %101 = arith.addf %97, %100 : vector<8x8xf32>
    %102 = arith.mulf %41, %43 : vector<8x8xf32>
    %cst_38 = arith.constant 2.500000e-01 : f32
    %103 = vector.broadcast %cst_38 : f32 to vector<8x8xf32>
    %104 = arith.mulf %102, %103 : vector<8x8xf32>
    %105 = arith.addf %101, %104 : vector<8x8xf32>
    %106 = arith.mulf %43, %43 : vector<8x8xf32>
    %cst_39 = arith.constant 0.111111112 : f32
    %107 = vector.broadcast %cst_39 : f32 to vector<8x8xf32>
    %108 = arith.mulf %106, %107 : vector<8x8xf32>
    %109 = arith.addf %105, %108 : vector<8x8xf32>
    %110 = vector.extract_strided_slice %26 {offsets = [40, 0], sizes = [8, 8], strides = [1, 1]} : vector<200x8xf32> to vector<8x8xf32>
    %111 = arith.mulf %110, %27 : vector<8x8xf32>
    %112 = vector.extract_strided_slice %26 {offsets = [48, 0], sizes = [8, 8], strides = [1, 1]} : vector<200x8xf32> to vector<8x8xf32>
    %113 = arith.mulf %112, %28 : vector<8x8xf32>
    %114 = vector.extract_strided_slice %26 {offsets = [56, 0], sizes = [8, 8], strides = [1, 1]} : vector<200x8xf32> to vector<8x8xf32>
    %115 = arith.mulf %114, %29 : vector<8x8xf32>
    %116 = vector.extract_strided_slice %26 {offsets = [64, 0], sizes = [8, 8], strides = [1, 1]} : vector<200x8xf32> to vector<8x8xf32>
    %117 = arith.mulf %116, %30 : vector<8x8xf32>
    %118 = vector.extract_strided_slice %26 {offsets = [72, 0], sizes = [8, 8], strides = [1, 1]} : vector<200x8xf32> to vector<8x8xf32>
    %119 = arith.mulf %118, %31 : vector<8x8xf32>
    %120 = arith.addf %111, %113 : vector<8x8xf32>
    %121 = arith.addf %120, %115 : vector<8x8xf32>
    %122 = arith.addf %121, %117 : vector<8x8xf32>
    %123 = arith.addf %122, %119 : vector<8x8xf32>
    %124 = arith.mulf %123, %123 : vector<8x8xf32>
    %125 = arith.addf %49, %124 : vector<8x8xf32>
    %126 = arith.mulf %111, %111 : vector<8x8xf32>
    %cst_40 = arith.constant 1.000000e+00 : f32
    %127 = vector.broadcast %cst_40 : f32 to vector<8x8xf32>
    %128 = arith.mulf %126, %127 : vector<8x8xf32>
    %129 = arith.addf %109, %128 : vector<8x8xf32>
    %130 = arith.mulf %111, %113 : vector<8x8xf32>
    %cst_41 = arith.constant 1.000000e+00 : f32
    %131 = vector.broadcast %cst_41 : f32 to vector<8x8xf32>
    %132 = arith.mulf %130, %131 : vector<8x8xf32>
    %133 = arith.addf %129, %132 : vector<8x8xf32>
    %134 = arith.mulf %111, %115 : vector<8x8xf32>
    %cst_42 = arith.constant 0.666666686 : f32
    %135 = vector.broadcast %cst_42 : f32 to vector<8x8xf32>
    %136 = arith.mulf %134, %135 : vector<8x8xf32>
    %137 = arith.addf %133, %136 : vector<8x8xf32>
    %138 = arith.mulf %111, %117 : vector<8x8xf32>
    %cst_43 = arith.constant 5.000000e-01 : f32
    %139 = vector.broadcast %cst_43 : f32 to vector<8x8xf32>
    %140 = arith.mulf %138, %139 : vector<8x8xf32>
    %141 = arith.addf %137, %140 : vector<8x8xf32>
    %142 = arith.mulf %111, %119 : vector<8x8xf32>
    %cst_44 = arith.constant 4.000000e-01 : f32
    %143 = vector.broadcast %cst_44 : f32 to vector<8x8xf32>
    %144 = arith.mulf %142, %143 : vector<8x8xf32>
    %145 = arith.addf %141, %144 : vector<8x8xf32>
    %146 = arith.mulf %113, %113 : vector<8x8xf32>
    %cst_45 = arith.constant 0.333333343 : f32
    %147 = vector.broadcast %cst_45 : f32 to vector<8x8xf32>
    %148 = arith.mulf %146, %147 : vector<8x8xf32>
    %149 = arith.addf %145, %148 : vector<8x8xf32>
    %150 = arith.mulf %113, %115 : vector<8x8xf32>
    %cst_46 = arith.constant 5.000000e-01 : f32
    %151 = vector.broadcast %cst_46 : f32 to vector<8x8xf32>
    %152 = arith.mulf %150, %151 : vector<8x8xf32>
    %153 = arith.addf %149, %152 : vector<8x8xf32>
    %154 = arith.mulf %113, %117 : vector<8x8xf32>
    %cst_47 = arith.constant 4.000000e-01 : f32
    %155 = vector.broadcast %cst_47 : f32 to vector<8x8xf32>
    %156 = arith.mulf %154, %155 : vector<8x8xf32>
    %157 = arith.addf %153, %156 : vector<8x8xf32>
    %158 = arith.mulf %113, %119 : vector<8x8xf32>
    %cst_48 = arith.constant 0.333333343 : f32
    %159 = vector.broadcast %cst_48 : f32 to vector<8x8xf32>
    %160 = arith.mulf %158, %159 : vector<8x8xf32>
    %161 = arith.addf %157, %160 : vector<8x8xf32>
    %162 = arith.mulf %115, %115 : vector<8x8xf32>
    %cst_49 = arith.constant 2.000000e-01 : f32
    %163 = vector.broadcast %cst_49 : f32 to vector<8x8xf32>
    %164 = arith.mulf %162, %163 : vector<8x8xf32>
    %165 = arith.addf %161, %164 : vector<8x8xf32>
    %166 = arith.mulf %115, %117 : vector<8x8xf32>
    %cst_50 = arith.constant 0.333333343 : f32
    %167 = vector.broadcast %cst_50 : f32 to vector<8x8xf32>
    %168 = arith.mulf %166, %167 : vector<8x8xf32>
    %169 = arith.addf %165, %168 : vector<8x8xf32>
    %170 = arith.mulf %115, %119 : vector<8x8xf32>
    %cst_51 = arith.constant 0.285714298 : f32
    %171 = vector.broadcast %cst_51 : f32 to vector<8x8xf32>
    %172 = arith.mulf %170, %171 : vector<8x8xf32>
    %173 = arith.addf %169, %172 : vector<8x8xf32>
    %174 = arith.mulf %117, %117 : vector<8x8xf32>
    %cst_52 = arith.constant 0.142857149 : f32
    %175 = vector.broadcast %cst_52 : f32 to vector<8x8xf32>
    %176 = arith.mulf %174, %175 : vector<8x8xf32>
    %177 = arith.addf %173, %176 : vector<8x8xf32>
    %178 = arith.mulf %117, %119 : vector<8x8xf32>
    %cst_53 = arith.constant 2.500000e-01 : f32
    %179 = vector.broadcast %cst_53 : f32 to vector<8x8xf32>
    %180 = arith.mulf %178, %179 : vector<8x8xf32>
    %181 = arith.addf %177, %180 : vector<8x8xf32>
    %182 = arith.mulf %119, %119 : vector<8x8xf32>
    %cst_54 = arith.constant 0.111111112 : f32
    %183 = vector.broadcast %cst_54 : f32 to vector<8x8xf32>
    %184 = arith.mulf %182, %183 : vector<8x8xf32>
    %185 = arith.addf %181, %184 : vector<8x8xf32>
    %186 = vector.extract_strided_slice %26 {offsets = [80, 0], sizes = [8, 8], strides = [1, 1]} : vector<200x8xf32> to vector<8x8xf32>
    %187 = arith.mulf %186, %27 : vector<8x8xf32>
    %188 = vector.extract_strided_slice %26 {offsets = [88, 0], sizes = [8, 8], strides = [1, 1]} : vector<200x8xf32> to vector<8x8xf32>
    %189 = arith.mulf %188, %28 : vector<8x8xf32>
    %190 = vector.extract_strided_slice %26 {offsets = [96, 0], sizes = [8, 8], strides = [1, 1]} : vector<200x8xf32> to vector<8x8xf32>
    %191 = arith.mulf %190, %29 : vector<8x8xf32>
    %192 = vector.extract_strided_slice %26 {offsets = [104, 0], sizes = [8, 8], strides = [1, 1]} : vector<200x8xf32> to vector<8x8xf32>
    %193 = arith.mulf %192, %30 : vector<8x8xf32>
    %194 = vector.extract_strided_slice %26 {offsets = [112, 0], sizes = [8, 8], strides = [1, 1]} : vector<200x8xf32> to vector<8x8xf32>
    %195 = arith.mulf %194, %31 : vector<8x8xf32>
    %196 = arith.addf %187, %189 : vector<8x8xf32>
    %197 = arith.addf %196, %191 : vector<8x8xf32>
    %198 = arith.addf %197, %193 : vector<8x8xf32>
    %199 = arith.addf %198, %195 : vector<8x8xf32>
    %200 = arith.mulf %199, %199 : vector<8x8xf32>
    %201 = arith.addf %125, %200 : vector<8x8xf32>
    %202 = arith.mulf %187, %187 : vector<8x8xf32>
    %cst_55 = arith.constant 1.000000e+00 : f32
    %203 = vector.broadcast %cst_55 : f32 to vector<8x8xf32>
    %204 = arith.mulf %202, %203 : vector<8x8xf32>
    %205 = arith.addf %185, %204 : vector<8x8xf32>
    %206 = arith.mulf %187, %189 : vector<8x8xf32>
    %cst_56 = arith.constant 1.000000e+00 : f32
    %207 = vector.broadcast %cst_56 : f32 to vector<8x8xf32>
    %208 = arith.mulf %206, %207 : vector<8x8xf32>
    %209 = arith.addf %205, %208 : vector<8x8xf32>
    %210 = arith.mulf %187, %191 : vector<8x8xf32>
    %cst_57 = arith.constant 0.666666686 : f32
    %211 = vector.broadcast %cst_57 : f32 to vector<8x8xf32>
    %212 = arith.mulf %210, %211 : vector<8x8xf32>
    %213 = arith.addf %209, %212 : vector<8x8xf32>
    %214 = arith.mulf %187, %193 : vector<8x8xf32>
    %cst_58 = arith.constant 5.000000e-01 : f32
    %215 = vector.broadcast %cst_58 : f32 to vector<8x8xf32>
    %216 = arith.mulf %214, %215 : vector<8x8xf32>
    %217 = arith.addf %213, %216 : vector<8x8xf32>
    %218 = arith.mulf %187, %195 : vector<8x8xf32>
    %cst_59 = arith.constant 4.000000e-01 : f32
    %219 = vector.broadcast %cst_59 : f32 to vector<8x8xf32>
    %220 = arith.mulf %218, %219 : vector<8x8xf32>
    %221 = arith.addf %217, %220 : vector<8x8xf32>
    %222 = arith.mulf %189, %189 : vector<8x8xf32>
    %cst_60 = arith.constant 0.333333343 : f32
    %223 = vector.broadcast %cst_60 : f32 to vector<8x8xf32>
    %224 = arith.mulf %222, %223 : vector<8x8xf32>
    %225 = arith.addf %221, %224 : vector<8x8xf32>
    %226 = arith.mulf %189, %191 : vector<8x8xf32>
    %cst_61 = arith.constant 5.000000e-01 : f32
    %227 = vector.broadcast %cst_61 : f32 to vector<8x8xf32>
    %228 = arith.mulf %226, %227 : vector<8x8xf32>
    %229 = arith.addf %225, %228 : vector<8x8xf32>
    %230 = arith.mulf %189, %193 : vector<8x8xf32>
    %cst_62 = arith.constant 4.000000e-01 : f32
    %231 = vector.broadcast %cst_62 : f32 to vector<8x8xf32>
    %232 = arith.mulf %230, %231 : vector<8x8xf32>
    %233 = arith.addf %229, %232 : vector<8x8xf32>
    %234 = arith.mulf %189, %195 : vector<8x8xf32>
    %cst_63 = arith.constant 0.333333343 : f32
    %235 = vector.broadcast %cst_63 : f32 to vector<8x8xf32>
    %236 = arith.mulf %234, %235 : vector<8x8xf32>
    %237 = arith.addf %233, %236 : vector<8x8xf32>
    %238 = arith.mulf %191, %191 : vector<8x8xf32>
    %cst_64 = arith.constant 2.000000e-01 : f32
    %239 = vector.broadcast %cst_64 : f32 to vector<8x8xf32>
    %240 = arith.mulf %238, %239 : vector<8x8xf32>
    %241 = arith.addf %237, %240 : vector<8x8xf32>
    %242 = arith.mulf %191, %193 : vector<8x8xf32>
    %cst_65 = arith.constant 0.333333343 : f32
    %243 = vector.broadcast %cst_65 : f32 to vector<8x8xf32>
    %244 = arith.mulf %242, %243 : vector<8x8xf32>
    %245 = arith.addf %241, %244 : vector<8x8xf32>
    %246 = arith.mulf %191, %195 : vector<8x8xf32>
    %cst_66 = arith.constant 0.285714298 : f32
    %247 = vector.broadcast %cst_66 : f32 to vector<8x8xf32>
    %248 = arith.mulf %246, %247 : vector<8x8xf32>
    %249 = arith.addf %245, %248 : vector<8x8xf32>
    %250 = arith.mulf %193, %193 : vector<8x8xf32>
    %cst_67 = arith.constant 0.142857149 : f32
    %251 = vector.broadcast %cst_67 : f32 to vector<8x8xf32>
    %252 = arith.mulf %250, %251 : vector<8x8xf32>
    %253 = arith.addf %249, %252 : vector<8x8xf32>
    %254 = arith.mulf %193, %195 : vector<8x8xf32>
    %cst_68 = arith.constant 2.500000e-01 : f32
    %255 = vector.broadcast %cst_68 : f32 to vector<8x8xf32>
    %256 = arith.mulf %254, %255 : vector<8x8xf32>
    %257 = arith.addf %253, %256 : vector<8x8xf32>
    %258 = arith.mulf %195, %195 : vector<8x8xf32>
    %cst_69 = arith.constant 0.111111112 : f32
    %259 = vector.broadcast %cst_69 : f32 to vector<8x8xf32>
    %260 = arith.mulf %258, %259 : vector<8x8xf32>
    %261 = arith.addf %257, %260 : vector<8x8xf32>
    %262 = vector.extract_strided_slice %26 {offsets = [120, 0], sizes = [8, 8], strides = [1, 1]} : vector<200x8xf32> to vector<8x8xf32>
    %263 = arith.mulf %262, %27 : vector<8x8xf32>
    %264 = vector.extract_strided_slice %26 {offsets = [128, 0], sizes = [8, 8], strides = [1, 1]} : vector<200x8xf32> to vector<8x8xf32>
    %265 = arith.mulf %264, %28 : vector<8x8xf32>
    %266 = vector.extract_strided_slice %26 {offsets = [136, 0], sizes = [8, 8], strides = [1, 1]} : vector<200x8xf32> to vector<8x8xf32>
    %267 = arith.mulf %266, %29 : vector<8x8xf32>
    %268 = vector.extract_strided_slice %26 {offsets = [144, 0], sizes = [8, 8], strides = [1, 1]} : vector<200x8xf32> to vector<8x8xf32>
    %269 = arith.mulf %268, %30 : vector<8x8xf32>
    %270 = vector.extract_strided_slice %26 {offsets = [152, 0], sizes = [8, 8], strides = [1, 1]} : vector<200x8xf32> to vector<8x8xf32>
    %271 = arith.mulf %270, %31 : vector<8x8xf32>
    %272 = arith.addf %263, %265 : vector<8x8xf32>
    %273 = arith.addf %272, %267 : vector<8x8xf32>
    %274 = arith.addf %273, %269 : vector<8x8xf32>
    %275 = arith.addf %274, %271 : vector<8x8xf32>
    %276 = arith.mulf %275, %275 : vector<8x8xf32>
    %277 = arith.addf %201, %276 : vector<8x8xf32>
    %278 = arith.mulf %263, %263 : vector<8x8xf32>
    %cst_70 = arith.constant 1.000000e+00 : f32
    %279 = vector.broadcast %cst_70 : f32 to vector<8x8xf32>
    %280 = arith.mulf %278, %279 : vector<8x8xf32>
    %281 = arith.addf %261, %280 : vector<8x8xf32>
    %282 = arith.mulf %263, %265 : vector<8x8xf32>
    %cst_71 = arith.constant 1.000000e+00 : f32
    %283 = vector.broadcast %cst_71 : f32 to vector<8x8xf32>
    %284 = arith.mulf %282, %283 : vector<8x8xf32>
    %285 = arith.addf %281, %284 : vector<8x8xf32>
    %286 = arith.mulf %263, %267 : vector<8x8xf32>
    %cst_72 = arith.constant 0.666666686 : f32
    %287 = vector.broadcast %cst_72 : f32 to vector<8x8xf32>
    %288 = arith.mulf %286, %287 : vector<8x8xf32>
    %289 = arith.addf %285, %288 : vector<8x8xf32>
    %290 = arith.mulf %263, %269 : vector<8x8xf32>
    %cst_73 = arith.constant 5.000000e-01 : f32
    %291 = vector.broadcast %cst_73 : f32 to vector<8x8xf32>
    %292 = arith.mulf %290, %291 : vector<8x8xf32>
    %293 = arith.addf %289, %292 : vector<8x8xf32>
    %294 = arith.mulf %263, %271 : vector<8x8xf32>
    %cst_74 = arith.constant 4.000000e-01 : f32
    %295 = vector.broadcast %cst_74 : f32 to vector<8x8xf32>
    %296 = arith.mulf %294, %295 : vector<8x8xf32>
    %297 = arith.addf %293, %296 : vector<8x8xf32>
    %298 = arith.mulf %265, %265 : vector<8x8xf32>
    %cst_75 = arith.constant 0.333333343 : f32
    %299 = vector.broadcast %cst_75 : f32 to vector<8x8xf32>
    %300 = arith.mulf %298, %299 : vector<8x8xf32>
    %301 = arith.addf %297, %300 : vector<8x8xf32>
    %302 = arith.mulf %265, %267 : vector<8x8xf32>
    %cst_76 = arith.constant 5.000000e-01 : f32
    %303 = vector.broadcast %cst_76 : f32 to vector<8x8xf32>
    %304 = arith.mulf %302, %303 : vector<8x8xf32>
    %305 = arith.addf %301, %304 : vector<8x8xf32>
    %306 = arith.mulf %265, %269 : vector<8x8xf32>
    %cst_77 = arith.constant 4.000000e-01 : f32
    %307 = vector.broadcast %cst_77 : f32 to vector<8x8xf32>
    %308 = arith.mulf %306, %307 : vector<8x8xf32>
    %309 = arith.addf %305, %308 : vector<8x8xf32>
    %310 = arith.mulf %265, %271 : vector<8x8xf32>
    %cst_78 = arith.constant 0.333333343 : f32
    %311 = vector.broadcast %cst_78 : f32 to vector<8x8xf32>
    %312 = arith.mulf %310, %311 : vector<8x8xf32>
    %313 = arith.addf %309, %312 : vector<8x8xf32>
    %314 = arith.mulf %267, %267 : vector<8x8xf32>
    %cst_79 = arith.constant 2.000000e-01 : f32
    %315 = vector.broadcast %cst_79 : f32 to vector<8x8xf32>
    %316 = arith.mulf %314, %315 : vector<8x8xf32>
    %317 = arith.addf %313, %316 : vector<8x8xf32>
    %318 = arith.mulf %267, %269 : vector<8x8xf32>
    %cst_80 = arith.constant 0.333333343 : f32
    %319 = vector.broadcast %cst_80 : f32 to vector<8x8xf32>
    %320 = arith.mulf %318, %319 : vector<8x8xf32>
    %321 = arith.addf %317, %320 : vector<8x8xf32>
    %322 = arith.mulf %267, %271 : vector<8x8xf32>
    %cst_81 = arith.constant 0.285714298 : f32
    %323 = vector.broadcast %cst_81 : f32 to vector<8x8xf32>
    %324 = arith.mulf %322, %323 : vector<8x8xf32>
    %325 = arith.addf %321, %324 : vector<8x8xf32>
    %326 = arith.mulf %269, %269 : vector<8x8xf32>
    %cst_82 = arith.constant 0.142857149 : f32
    %327 = vector.broadcast %cst_82 : f32 to vector<8x8xf32>
    %328 = arith.mulf %326, %327 : vector<8x8xf32>
    %329 = arith.addf %325, %328 : vector<8x8xf32>
    %330 = arith.mulf %269, %271 : vector<8x8xf32>
    %cst_83 = arith.constant 2.500000e-01 : f32
    %331 = vector.broadcast %cst_83 : f32 to vector<8x8xf32>
    %332 = arith.mulf %330, %331 : vector<8x8xf32>
    %333 = arith.addf %329, %332 : vector<8x8xf32>
    %334 = arith.mulf %271, %271 : vector<8x8xf32>
    %cst_84 = arith.constant 0.111111112 : f32
    %335 = vector.broadcast %cst_84 : f32 to vector<8x8xf32>
    %336 = arith.mulf %334, %335 : vector<8x8xf32>
    %337 = arith.addf %333, %336 : vector<8x8xf32>
    %338 = vector.extract_strided_slice %26 {offsets = [160, 0], sizes = [8, 8], strides = [1, 1]} : vector<200x8xf32> to vector<8x8xf32>
    %339 = arith.mulf %338, %27 : vector<8x8xf32>
    %340 = vector.extract_strided_slice %26 {offsets = [168, 0], sizes = [8, 8], strides = [1, 1]} : vector<200x8xf32> to vector<8x8xf32>
    %341 = arith.mulf %340, %28 : vector<8x8xf32>
    %342 = vector.extract_strided_slice %26 {offsets = [176, 0], sizes = [8, 8], strides = [1, 1]} : vector<200x8xf32> to vector<8x8xf32>
    %343 = arith.mulf %342, %29 : vector<8x8xf32>
    %344 = vector.extract_strided_slice %26 {offsets = [184, 0], sizes = [8, 8], strides = [1, 1]} : vector<200x8xf32> to vector<8x8xf32>
    %345 = arith.mulf %344, %30 : vector<8x8xf32>
    %346 = vector.extract_strided_slice %26 {offsets = [192, 0], sizes = [8, 8], strides = [1, 1]} : vector<200x8xf32> to vector<8x8xf32>
    %347 = arith.mulf %346, %31 : vector<8x8xf32>
    %348 = arith.addf %339, %341 : vector<8x8xf32>
    %349 = arith.addf %348, %343 : vector<8x8xf32>
    %350 = arith.addf %349, %345 : vector<8x8xf32>
    %351 = arith.addf %350, %347 : vector<8x8xf32>
    %352 = arith.mulf %351, %351 : vector<8x8xf32>
    %353 = arith.addf %277, %352 : vector<8x8xf32>
    %354 = arith.mulf %339, %339 : vector<8x8xf32>
    %cst_85 = arith.constant 1.000000e+00 : f32
    %355 = vector.broadcast %cst_85 : f32 to vector<8x8xf32>
    %356 = arith.mulf %354, %355 : vector<8x8xf32>
    %357 = arith.addf %337, %356 : vector<8x8xf32>
    %358 = arith.mulf %339, %341 : vector<8x8xf32>
    %cst_86 = arith.constant 1.000000e+00 : f32
    %359 = vector.broadcast %cst_86 : f32 to vector<8x8xf32>
    %360 = arith.mulf %358, %359 : vector<8x8xf32>
    %361 = arith.addf %357, %360 : vector<8x8xf32>
    %362 = arith.mulf %339, %343 : vector<8x8xf32>
    %cst_87 = arith.constant 0.666666686 : f32
    %363 = vector.broadcast %cst_87 : f32 to vector<8x8xf32>
    %364 = arith.mulf %362, %363 : vector<8x8xf32>
    %365 = arith.addf %361, %364 : vector<8x8xf32>
    %366 = arith.mulf %339, %345 : vector<8x8xf32>
    %cst_88 = arith.constant 5.000000e-01 : f32
    %367 = vector.broadcast %cst_88 : f32 to vector<8x8xf32>
    %368 = arith.mulf %366, %367 : vector<8x8xf32>
    %369 = arith.addf %365, %368 : vector<8x8xf32>
    %370 = arith.mulf %339, %347 : vector<8x8xf32>
    %cst_89 = arith.constant 4.000000e-01 : f32
    %371 = vector.broadcast %cst_89 : f32 to vector<8x8xf32>
    %372 = arith.mulf %370, %371 : vector<8x8xf32>
    %373 = arith.addf %369, %372 : vector<8x8xf32>
    %374 = arith.mulf %341, %341 : vector<8x8xf32>
    %cst_90 = arith.constant 0.333333343 : f32
    %375 = vector.broadcast %cst_90 : f32 to vector<8x8xf32>
    %376 = arith.mulf %374, %375 : vector<8x8xf32>
    %377 = arith.addf %373, %376 : vector<8x8xf32>
    %378 = arith.mulf %341, %343 : vector<8x8xf32>
    %cst_91 = arith.constant 5.000000e-01 : f32
    %379 = vector.broadcast %cst_91 : f32 to vector<8x8xf32>
    %380 = arith.mulf %378, %379 : vector<8x8xf32>
    %381 = arith.addf %377, %380 : vector<8x8xf32>
    %382 = arith.mulf %341, %345 : vector<8x8xf32>
    %cst_92 = arith.constant 4.000000e-01 : f32
    %383 = vector.broadcast %cst_92 : f32 to vector<8x8xf32>
    %384 = arith.mulf %382, %383 : vector<8x8xf32>
    %385 = arith.addf %381, %384 : vector<8x8xf32>
    %386 = arith.mulf %341, %347 : vector<8x8xf32>
    %cst_93 = arith.constant 0.333333343 : f32
    %387 = vector.broadcast %cst_93 : f32 to vector<8x8xf32>
    %388 = arith.mulf %386, %387 : vector<8x8xf32>
    %389 = arith.addf %385, %388 : vector<8x8xf32>
    %390 = arith.mulf %343, %343 : vector<8x8xf32>
    %cst_94 = arith.constant 2.000000e-01 : f32
    %391 = vector.broadcast %cst_94 : f32 to vector<8x8xf32>
    %392 = arith.mulf %390, %391 : vector<8x8xf32>
    %393 = arith.addf %389, %392 : vector<8x8xf32>
    %394 = arith.mulf %343, %345 : vector<8x8xf32>
    %cst_95 = arith.constant 0.333333343 : f32
    %395 = vector.broadcast %cst_95 : f32 to vector<8x8xf32>
    %396 = arith.mulf %394, %395 : vector<8x8xf32>
    %397 = arith.addf %393, %396 : vector<8x8xf32>
    %398 = arith.mulf %343, %347 : vector<8x8xf32>
    %cst_96 = arith.constant 0.285714298 : f32
    %399 = vector.broadcast %cst_96 : f32 to vector<8x8xf32>
    %400 = arith.mulf %398, %399 : vector<8x8xf32>
    %401 = arith.addf %397, %400 : vector<8x8xf32>
    %402 = arith.mulf %345, %345 : vector<8x8xf32>
    %cst_97 = arith.constant 0.142857149 : f32
    %403 = vector.broadcast %cst_97 : f32 to vector<8x8xf32>
    %404 = arith.mulf %402, %403 : vector<8x8xf32>
    %405 = arith.addf %401, %404 : vector<8x8xf32>
    %406 = arith.mulf %345, %347 : vector<8x8xf32>
    %cst_98 = arith.constant 2.500000e-01 : f32
    %407 = vector.broadcast %cst_98 : f32 to vector<8x8xf32>
    %408 = arith.mulf %406, %407 : vector<8x8xf32>
    %409 = arith.addf %405, %408 : vector<8x8xf32>
    %410 = arith.mulf %347, %347 : vector<8x8xf32>
    %cst_99 = arith.constant 0.111111112 : f32
    %411 = vector.broadcast %cst_99 : f32 to vector<8x8xf32>
    %412 = arith.mulf %410, %411 : vector<8x8xf32>
    %413 = arith.addf %409, %412 : vector<8x8xf32>
    %c0_100 = arith.constant 0 : index
    %c0_101 = arith.constant 0 : index
    %c0_102 = arith.constant 0 : index
    %414 = vector.load %arg8[%c0_100, %c0_101, %c0_102] : memref<1x1x1xf32, #tpu.memory_space<vmem>>, vector<1x1x1xf32>
    %415 = vector.shape_cast %414 : vector<1x1x1xf32> to vector<1x1xf32>
    %416 = arith.mulf %3, %413 : vector<8x8xf32>
    %417 = vector.broadcast %415 : vector<1x1xf32> to vector<8x8xf32>
    %418 = arith.addf %417, %416 : vector<8x8xf32>
    %419 = math.log %353 : vector<8x8xf32>
    %cst_103 = arith.constant dense<0.000000e+00> : vector<8xf32>
    %420 = vector.multi_reduction <add>, %419, %cst_103 [0] : vector<8x8xf32> to vector<8xf32>
    %421 = vector.shape_cast %420 : vector<8xf32> to vector<1x8xf32>
    %cst_104 = arith.constant dense<0.000000e+00> : vector<8xf32>
    %422 = vector.multi_reduction <add>, %418, %cst_104 [1] : vector<8x8xf32> to vector<8xf32>
    %423 = vector.shape_cast %422 : vector<8xf32> to vector<8x1xf32>
    %cst_105 = arith.constant 8.000000e+00 : f32
    %424 = vector.broadcast %cst_105 : f32 to vector<8x1xf32>
    %425 = arith.divf %423, %424 : vector<8x1xf32>
    %426 = vector.broadcast %425 : vector<8x1xf32> to vector<8x8xf32>
    %427 = arith.subf %418, %426 : vector<8x8xf32>
    %428 = arith.mulf %427, %427 : vector<8x8xf32>
    %cst_106 = arith.constant dense<0.000000e+00> : vector<8xf32>
    %429 = vector.multi_reduction <add>, %428, %cst_106 [1] : vector<8x8xf32> to vector<8xf32>
    %430 = vector.shape_cast %429 : vector<8xf32> to vector<8x1xf32>
    %cst_107 = arith.constant 8.000000e+00 : f32
    %431 = vector.broadcast %cst_107 : f32 to vector<8x1xf32>
    %432 = arith.divf %430, %431 : vector<8x1xf32>
    %cst_108 = arith.constant 9.99999974E-6 : f32
    %433 = vector.broadcast %cst_108 : f32 to vector<8x1xf32>
    %434 = arith.addf %432, %433 : vector<8x1xf32>
    %c0_109 = arith.constant 0 : index
    %c0_110 = arith.constant 0 : index
    %c0_111 = arith.constant 0 : index
    %435 = vector.load %arg9[%c0_109, %c0_110, %c0_111] : memref<1x8x1xf32, #tpu.memory_space<vmem>>, vector<1x8x1xf32>
    %436 = vector.shape_cast %435 : vector<1x8x1xf32> to vector<8x1xf32>
    %437 = math.exp %436 : vector<8x1xf32>
    %438 = math.rsqrt %434 : vector<8x1xf32>
    %439 = vector.broadcast %438 : vector<8x1xf32> to vector<8x8xf32>
    %440 = arith.mulf %427, %439 : vector<8x8xf32>
    %441 = vector.broadcast %437 : vector<8x1xf32> to vector<8x8xf32>
    %442 = arith.mulf %441, %440 : vector<8x8xf32>
    %c0_112 = arith.constant 0 : index
    %c0_113 = arith.constant 0 : index
    %c0_114 = arith.constant 0 : index
    %443 = vector.load %arg10[%c0_112, %c0_113, %c0_114] : memref<1x8x1xf32, #tpu.memory_space<vmem>>, vector<1x8x1xf32>
    %444 = vector.shape_cast %443 : vector<1x8x1xf32> to vector<8x1xf32>
    %445 = vector.broadcast %444 : vector<8x1xf32> to vector<8x8xf32>
    %446 = arith.addf %442, %445 : vector<8x8xf32>
    %c0_115 = arith.constant 0 : index
    %c0_116 = arith.constant 0 : index
    %c0_117 = arith.constant 0 : index
    %447 = vector.load %arg9[%c0_115, %c0_116, %c0_117] : memref<1x8x1xf32, #tpu.memory_space<vmem>>, vector<1x8x1xf32>
    %448 = vector.shape_cast %447 : vector<1x8x1xf32> to vector<8x1xf32>
    %449 = math.log %434 : vector<8x1xf32>
    %cst_118 = arith.constant 5.000000e-01 : f32
    %450 = vector.broadcast %cst_118 : f32 to vector<8x1xf32>
    %451 = arith.mulf %450, %449 : vector<8x1xf32>
    %452 = arith.subf %448, %451 : vector<8x1xf32>
    %453 = vector.shape_cast %452 : vector<8x1xf32> to vector<1x8x1xf32>
    %cst_119 = arith.constant dense<0.000000e+00> : vector<1xf32>
    %454 = vector.multi_reduction <add>, %453, %cst_119 [1, 2] : vector<1x8x1xf32> to vector<1xf32>
    %455 = vector.shape_cast %454 : vector<1xf32> to vector<1x1x1xf32>
    %456 = vector.extract %455[0, 0, 0] : f32 from vector<1x1x1xf32>
    %c0_120 = arith.constant 0 : index
    %c0_121 = arith.constant 0 : index
    %457 = vector.load %arg13[%c0_120, %c0_121] : memref<8x8xf32, #tpu.memory_space<vmem>>, vector<8x8xf32>
    tpu.vector_store %arg13[%c0_120, %c0_121], %446 {strides = array<i32>} : memref<8x8xf32, #tpu.memory_space<vmem>>, vector<8x8xf32>,
    %c0_122 = arith.constant 0 : index
    %c0_123 = arith.constant 0 : index
    %458 = vector.load %arg14[%c0_122, %c0_123] : memref<1x8xf32, #tpu.memory_space<vmem>>, vector<1x8xf32>
    %459 = arith.addf %458, %421 : vector<1x8xf32>
    %460 = vector.broadcast %456 : f32 to vector<1x8xf32>
    %461 = arith.addf %459, %460 : vector<1x8xf32>
    %c0_124 = arith.constant 0 : index
    %c0_125 = arith.constant 0 : index
    %462 = vector.load %arg14[%c0_124, %c0_125] : memref<1x8xf32, #tpu.memory_space<vmem>>, vector<1x8xf32>
    tpu.vector_store %arg14[%c0_124, %c0_125], %461 {strides = array<i32>} : memref<1x8xf32, #tpu.memory_space<vmem>>, vector<1x8xf32>,
    %c1_i32 = arith.constant 1 : i32
    %463 = arith.cmpi eq, %arg0, %c1_i32 : i32
    %464 = arith.extui %463 : i1 to i32
    %c0_i32_126 = arith.constant 0 : i32
    %465 = arith.cmpi ne, %464, %c0_i32_126 : i32
    scf.if %465 {
      %c0_127 = arith.constant 0 : index
      %c0_128 = arith.constant 0 : index
      %466 = vector.load %arg13[%c0_127, %c0_128] : memref<8x8xf32, #tpu.memory_space<vmem>>, vector<8x8xf32>
      %c0_129 = arith.constant 0 : index
      %c0_130 = arith.constant 0 : index
      %467 = vector.load %arg11[%c0_129, %c0_130] : memref<8x8xf32, #tpu.memory_space<vmem>>, vector<8x8xf32>
      tpu.vector_store %arg11[%c0_129, %c0_130], %466 {strides = array<i32>} : memref<8x8xf32, #tpu.memory_space<vmem>>, vector<8x8xf32>,
      %c0_131 = arith.constant 0 : index
      %c0_132 = arith.constant 0 : index
      %468 = vector.load %arg14[%c0_131, %c0_132] : memref<1x8xf32, #tpu.memory_space<vmem>>, vector<1x8xf32>
      %c0_133 = arith.constant 0 : index
      %c0_134 = arith.constant 0 : index
      %469 = vector.load %arg12[%c0_133, %c0_134] : memref<1x8xf32, #tpu.memory_space<vmem>>, vector<1x8xf32>
      tpu.vector_store %arg12[%c0_133, %c0_134], %468 {strides = array<i32>} : memref<1x8xf32, #tpu.memory_space<vmem>>, vector<1x8xf32>,
    } else {
    }
    return
  }
  func.func @transform_0(%arg0: i32) -> (i32, i32) {
    %c0_i32 = arith.constant 0 : i32
    %c0_i32_0 = arith.constant 0 : i32
    %c0_i32_1 = arith.constant 0 : i32
    return %c0_i32, %c0_i32_0 : i32, i32
  }
  func.func @transform_1(%arg0: i32) -> (i32, i32, i32) {
    %c0_i32 = arith.constant 0 : i32
    %c0_i32_0 = arith.constant 0 : i32
    %c0_i32_1 = arith.constant 0 : i32
    return %arg0, %c0_i32, %c0_i32_0 : i32, i32, i32
  }
  func.func @transform_2(%arg0: i32) -> (i32, i32, i32) {
    %c0_i32 = arith.constant 0 : i32
    %c0_i32_0 = arith.constant 0 : i32
    %c0_i32_1 = arith.constant 0 : i32
    return %arg0, %c0_i32, %c0_i32_0 : i32, i32, i32
  }
  func.func @transform_3(%arg0: i32) -> (i32, i32, i32) {
    %c0_i32 = arith.constant 0 : i32
    %c0_i32_0 = arith.constant 0 : i32
    %c0_i32_1 = arith.constant 0 : i32
    return %arg0, %c0_i32, %c0_i32_0 : i32, i32, i32
  }
  func.func @transform_4(%arg0: i32) -> (i32, i32, i32) {
    %c0_i32 = arith.constant 0 : i32
    %c0_i32_0 = arith.constant 0 : i32
    %c0_i32_1 = arith.constant 0 : i32
    return %arg0, %c0_i32, %c0_i32_0 : i32, i32, i32
  }
  func.func @transform_5(%arg0: i32) -> (i32, i32, i32) {
    %c0_i32 = arith.constant 0 : i32
    %c0_i32_0 = arith.constant 0 : i32
    %c0_i32_1 = arith.constant 0 : i32
    return %arg0, %c0_i32, %c0_i32_0 : i32, i32, i32
  }
  func.func @transform_6(%arg0: i32) -> (i32, i32, i32) {
    %c0_i32 = arith.constant 0 : i32
    %c0_i32_0 = arith.constant 0 : i32
    %c0_i32_1 = arith.constant 0 : i32
    return %arg0, %c0_i32, %c0_i32_0 : i32, i32, i32
  }
  func.func @transform_7(%arg0: i32) -> (i32, i32, i32) {
    %c0_i32 = arith.constant 0 : i32
    %c0_i32_0 = arith.constant 0 : i32
    %c0_i32_1 = arith.constant 0 : i32
    return %arg0, %c0_i32, %c0_i32_0 : i32, i32, i32
  }
  func.func @transform_8(%arg0: i32) -> (i32, i32, i32) {
    %c0_i32 = arith.constant 0 : i32
    %c0_i32_0 = arith.constant 0 : i32
    %c0_i32_1 = arith.constant 0 : i32
    return %arg0, %c0_i32, %c0_i32_0 : i32, i32, i32
  }
  func.func @transform_9(%arg0: i32) -> (i32, i32, i32) {
    %c0_i32 = arith.constant 0 : i32
    %c0_i32_0 = arith.constant 0 : i32
    %c0_i32_1 = arith.constant 0 : i32
    return %arg0, %c0_i32, %c0_i32_0 : i32, i32, i32
  }
  func.func @transform_10(%arg0: i32) -> (i32, i32) {
    %c0_i32 = arith.constant 0 : i32
    %c0_i32_0 = arith.constant 0 : i32
    %c0_i32_1 = arith.constant 0 : i32
    return %c0_i32, %c0_i32_0 : i32, i32
  }
  func.func @transform_11(%arg0: i32) -> (i32, i32) {
    %c0_i32 = arith.constant 0 : i32
    %c0_i32_0 = arith.constant 0 : i32
    %c0_i32_1 = arith.constant 0 : i32
    return %c0_i32, %c0_i32_0 : i32, i32
  }
}

</mosaic_0001>

<bundles_post_ra>
// kernel: tinv_sos_forward.1
= control target key start
LH: loop header
LB: loop body
LE: loop exit
PB: predicated region body
PF: predicated region fallthrough
CT: control target
= control target key end

     0   :  { %s2699_s0 = inlined_call_operand.vmem [shape: f32[8,8], index: 0, kind: input, shape index: {}]   ;;  %s2700_s1 = inlined_call_operand.vmem [shape: f32[2,32,8], index: 1, kind: input, shape index: {}]   ;;  %s2701_s2 = inlined_call_operand.vmem [shape: f32[2,32,1], index: 2, kind: input, shape index: {}]   ;;  %s2702_s3 = inlined_call_operand.vmem [shape: f32[2,32,32], index: 3, kind: input, shape index: {}]   ;;  %s2703_s4 = inlined_call_operand.vmem [shape: f32[2,32,1], index: 4, kind: input, shape index: {}]   ;;  %s2704_s5 = inlined_call_operand.vmem [shape: f32[2,200,32], index: 5, kind: input, shape index: {}]   ;;  %s2705_s6 = inlined_call_operand.vmem [shape: f32[2,200,1], index: 6, kind: input, shape index: {}]   ;;  %s2706_s7 = inlined_call_operand.vmem [shape: f32[2,1,1], index: 7, kind: input, shape index: {}]   ;;  %s2707_s8 = inlined_call_operand.vmem [shape: f32[2,8,1], index: 8, kind: input, shape index: {}]   ;;  %s2708_s9 = inlined_call_operand.vmem [shape: f32[2,8,1], index: 9, kind: input, shape index: {}]   ;;  %s2709_s10 = inlined_call_operand.vmem [shape: f32[8,8], index: 10, kind: output, shape index: {0}]   ;;  %s2710_s11 = inlined_call_operand.hbm [shape: f32[1,8], index: 11, kind: output, shape index: {1}]  }
   0x1   :  { %2712 = sst [smem:[#allocation8_spill]] %s2700_s1 }
   0x2   :  { %2713 = sst [smem:[#allocation9_spill]] %s2701_s2 }
   0x3   :  { %2714 = sst [smem:[#allocation10_spill]] %s2702_s3 }
   0x4   :  { %17 = vsyncpa [#allocation5], 0  ;;  %s2088_s17 = smov 0  }
   0x5 LB: > { %2715 = sst [smem:[#allocation7_spill]] %s2021_s17  ;;  %s2094_s18 = sadd.s32 4294967295, %s2021_s17   ;;  %s2021_s17 = sphi %s2088_s17, %s23_s17  }
   0x6   : > { %p1726_p0 = scmp.ge.s32.totalorder %s2021_s17, 1  ;;  %p407_p1 = scmp.lt.s32.totalorder %s2021_s17, 3 }
   0x8   : > { %p408_p2 = pnand %p1726_p0, %p407_p1 }
   0x9   : > { %p478_p3 = scmp.lt.s32.totalorder (!%p408_p2), %s2094_s18, 1  ;;  %s2716_s1 = sld [smem:[#allocation8_spill]] (!%p408_p2) }
   0xa   : > { %411 = sbr.rel (%p408_p2) target bundleno = 1380 (0x564), region = 60  ;;  %s2717_s2 = sld [smem:[#allocation9_spill]] (!%p408_p2) }
   0xb   : > { %s2718_s3 = sld [smem:[#allocation10_spill]] (!%p408_p2)  ;;  %p1739_p4 = scmp.ne.s32.totalorder (!%p408_p2), %s2094_s18, 0 }
   0xf   : > { %s2100_s19 = scalar_select %p478_p3, %s2094_s18, 1 }
  0x11   : > { %s1779_s20 = sshll.u32 %s2100_s19, 5  ;;  %s1938_s21 = smul.u32 200, %s2100_s19 }
  0x12   : > { %s2107_s24 = scalar_lea.vmem %s2716_s1, %s1779_s20  ;;  %s2112_s27 = scalar_lea.vmem %s2717_s2, %s1779_s20 }
  0x13   : > { %s2117_s30 = scalar_lea.vmem %s2718_s3, %s1779_s20  ;;  %s2122_s14 = scalar_lea.vmem %s2703_s4, %s1779_s20 }
  0x14   : > { %s2127_s22 = scalar_lea.vmem %s2704_s5, %s1938_s21  ;;  %s2132_s25 = scalar_lea.vmem %s2705_s6, %s1938_s21 }
  0x15   : > { %s510_s28 = scalar_lea.vmem %s2706_s7, %s2100_s19  ;;  %s1737_s29 = sshll.u32 %s2100_s19, 3 }
  0x16   : > { %s2142_s20 = scalar_lea.vmem %s2707_s8, %s1737_s29  ;;  %s2147_s15 = scalar_lea.vmem %s2708_s9, %s1737_s29 }
  0x17   : > { %522 = sbr.rel (%p1739_p4) target bundleno = 31 (0x1f), region = 64 }
  0x1c   : > { %v523_v0 = vld [vmem:[%s2699_s0] sm:$0xff]  ;;  %vm524_vm0 = vcmask 64512   ;;  %vm526_vm1 = vcmask 57344   ;;  %v2023_v1 = vmov 0.0  }
  0x1d   : > { %525 = vst.msk [vmem:[#allocation2] sm:$0xff] %vm524_vm0, %v523_v0 }
  0x1e   : > { %527 = vst.msk [vmem:[#allocation3] sm:$0x1] %vm526_vm1, %v2023_v1 }
  0x1f PF: > { %v529_v3 = vld [vmem:[%s2107_s24] sm:$0xff]  ;;  %vm557_vm2 = vcmask 64512   ;;  %v530_v4 = vld [vmem:[%s2107_s24 + $0x8] sm:$0xff]  ;;  %v531_v5 = vld [vmem:[%s2107_s24 + $0x10] sm:$0xff]  ;;  %v2024_v7 = vmov 0   ;;  %vm687_vm3 = vcmask 261120  }
  0x20   : > { %1827 = vmatprep.mubr.msk.f32.mxu1 %vm557_vm2, %v529_v3  ;;  %v536_v6 = vld [vmem:[%s2112_s27 + $0x18] sm:$0xff]  ;;  %1960 = vset.pattern.permute.xlu0 %v2024_v7  ;;  %v534_v8 = vld [vmem:[%s2112_s27 + $0x8] sm:$0xff]  ;;  %v535_v10 = vld [vmem:[%s2112_s27 + $0x10] sm:$0xff]  ;;  %v2025_v62 = vmov 0.0   ;;  %vm2026_vm4 = vmmov 0   ;;  %vm1552_vm5 = vcmask 7168  }
  0x21   : > { %554 = vperm.xlu0 %1960, %v536_v6   ;;  %v532_v9 = vld [vmem:[%s2107_s24 + $0x18] sm:$0xff]  ;;  %1961 = vset.pattern.permute.xlu1 %v2024_v7  ;;  %v533_v11 = vld [vmem:[%s2112_s27] sm:$0xff]  ;;  %v665_v13 = vld [vmem:[%s2122_s14 + $0x10] sm:$0xff]  ;;  %vm1568_vm6 = vcmask 57344   ;;  %p1774_p5 = scmp.ne.s32.totalorder %s2094_s18, 1 }
  0x22   : > { %544 = vperm.xlu1 %1961, %v534_v8   ;;  %v666_v12 = vld [vmem:[%s2122_s14 + $0x18] sm:$0xff]  ;;  %v664_v14 = vld [vmem:[%s2122_s14 + $0x8] sm:$0xff]  ;;  %v663_v15 = vld [vmem:[%s2122_s14] sm:$0xff]  ;;  %1847 = vmatprep.subr.mxu0 %v2025_v62 }
  0x23   : > { %v815_v16 = vld [vmem:[%s2132_s25 + $0x8] sm:$0xff]  ;;  %v816_v17 = vld [vmem:[%s2132_s25 + $0x10] sm:$0xff]  ;;  %v814_v18 = vld [vmem:[%s2132_s25] sm:$0xff]  ;;  %1855 = vmatprep.mubr.msk.f32.mxu0 %vm2026_vm4, %v2025_v62 }
  0x24   : > { %v2153_v2 = vld [vmem:[#allocation2] sm:$0xff]  ;;  %v817_v19 = vld [vmem:[%s2132_s25 + $0x18] sm:$0xff]  ;;  %v819_v21 = vld [vmem:[%s2132_s25 + $0x28] sm:$0xff] }
  0x25   : > { %1825 = vmatprep.subr.mxu1 %v2153_v2  ;;  %549 = vperm.xlu0 %1960, %v535_v10   ;;  %v818_v20 = vld [vmem:[%s2132_s25 + $0x20] sm:$0xff]  ;;  %v820_v22 = vld [vmem:[%s2132_s25 + $0x30] sm:$0xff]  ;;  %v821_v23 = vld [vmem:[%s2132_s25 + $0x38] sm:$0xff] }
  0x26   : > { %1826 = vmatpush3.msra.mxu1 %v2153_v2  ;;  %539 = vperm.xlu1 %1961, %v533_v11   ;;  %v822_v24 = vld [vmem:[%s2132_s25 + $0x40] sm:$0xff]  ;;  %v823_v25 = vld [vmem:[%s2132_s25 + $0x48] sm:$0xff]  ;;  %v824_v26 = vld [vmem:[%s2132_s25 + $0x50] sm:$0xff] }
  0x27   : > { %1828 = vmatmul.mubr.msk.f32.vlgmr.msra.gmra.mxu1 %vm557_vm2, %v530_v4  ;;  %v825_v27 = vld [vmem:[%s2132_s25 + $0x58] sm:$0xff]  ;;  %v826_v28 = vld [vmem:[%s2132_s25 + $0x60] sm:$0xff]  ;;  %v827_v29 = vld [vmem:[%s2132_s25 + $0x68] sm:$0xff] }
  0x28   : > { %1830 = vmatprep.mubr.msk.f32.mxu1 %vm557_vm2, %v531_v5  ;;  %v828_v30 = vld [vmem:[%s2132_s25 + $0x70] sm:$0xff]  ;;  %v829_v31 = vld [vmem:[%s2132_s25 + $0x78] sm:$0xff]  ;;  %v830_v32 = vld [vmem:[%s2132_s25 + $0x80] sm:$0xff] }
  0x29   : > { %684 = vperm.xlu0 %1960, %v666_v12   ;;  %v831_v33 = vld [vmem:[%s2132_s25 + $0x88] sm:$0xff]  ;;  %v832_v34 = vld [vmem:[%s2132_s25 + $0x90] sm:$0xff]  ;;  %v833_v35 = vld [vmem:[%s2132_s25 + $0x98] sm:$0xff] }
  0x2a   : > { %679 = vperm.xlu1 %1961, %v665_v13   ;;  %v834_v36 = vld [vmem:[%s2132_s25 + $0xa0] sm:$0xff]  ;;  %v835_v37 = vld [vmem:[%s2132_s25 + $0xa8] sm:$0xff]  ;;  %v836_v38 = vld [vmem:[%s2132_s25 + $0xb0] sm:$0xff] }
  0x2b   : > { %1831 = vmatmul.mubr.msk.f32.gmra.mxu1 %vm557_vm2, %v532_v9  ;;  %v837_v39 = vld [vmem:[%s2132_s25 + $0xb8] sm:$0xff]  ;;  %v838_v40 = vld [vmem:[%s2132_s25 + $0xc0] sm:$0xff]  ;;  %v660_v59 = vld [vmem:[%s2117_s30 + $0x8] sm:$0xff] }
  0x2c   : > { %v1773_v41 = vld [vmem:[%s510_s28] ss:$0 sm:$0xff]  ;;  %v661_v60 = vld [vmem:[%s2117_s30 + $0x10] sm:$0xff]  ;;  %v662_v61 = vld [vmem:[%s2117_s30 + $0x18] sm:$0xff] }
  0x2d   : > { %674 = vperm.xlu0 %1960, %v664_v14   ;;  %v659_v42 = vld [vmem:[%s2117_s30] sm:$0xff] }
  0x2e   : > { %669 = vperm.xlu1 %1961, %v663_v15   ;;  %1841 = vmatprep.mubr.msk.f32.mxu1 %vm687_vm3, %v659_v42  ;;  %v789_v15 = vld [vmem:[%s2127_s22] sm:$0xff] }
  0x31   : > { %846 = vperm.xlu0 %1960, %v815_v16   ;;  %v803_v16 = vld [vmem:[%s2127_s22 + $0x70] sm:$0xff] }
  0x32   : > { %851 = vperm.xlu1 %1961, %v816_v17  }
  0x35   : > { %841 = vperm.xlu0 %1960, %v814_v18   ;;  %v790_v18 = vld [vmem:[%s2127_s22 + $0x8] sm:$0xff] }
  0x36   : > { %856 = vperm.xlu1 %1961, %v817_v19   ;;  %v804_v19 = vld [vmem:[%s2127_s22 + $0x78] sm:$0xff] }
  0x39   : > { %861 = vperm.xlu0 %1960, %v818_v20   ;;  %v791_v20 = vld [vmem:[%s2127_s22 + $0x10] sm:$0xff] }
  0x3a   : > { %866 = vperm.xlu1 %1961, %v819_v21   ;;  %v805_v21 = vld [vmem:[%s2127_s22 + $0x80] sm:$0xff] }
  0x3d   : > { %871 = vperm.xlu0 %1960, %v820_v22   ;;  %v792_v22 = vld [vmem:[%s2127_s22 + $0x18] sm:$0xff] }
  0x3e   : > { %876 = vperm.xlu1 %1961, %v821_v23   ;;  %v806_v23 = vld [vmem:[%s2127_s22 + $0x88] sm:$0xff] }
  0x41   : > { %881 = vperm.xlu0 %1960, %v822_v24   ;;  %v793_v24 = vld [vmem:[%s2127_s22 + $0x20] sm:$0xff] }
  0x42   : > { %886 = vperm.xlu1 %1961, %v823_v25   ;;  %v807_v25 = vld [vmem:[%s2127_s22 + $0x90] sm:$0xff] }
  0x45   : > { %891 = vperm.xlu0 %1960, %v824_v26   ;;  %v794_v26 = vld [vmem:[%s2127_s22 + $0x28] sm:$0xff] }
  0x46   : > { %896 = vperm.xlu1 %1961, %v825_v27   ;;  %v808_v27 = vld [vmem:[%s2127_s22 + $0x98] sm:$0xff] }
  0x49   : > { %901 = vperm.xlu0 %1960, %v826_v28   ;;  %v795_v28 = vld [vmem:[%s2127_s22 + $0x30] sm:$0xff] }
  0x4a   : > { %906 = vperm.xlu1 %1961, %v827_v29   ;;  %v809_v29 = vld [vmem:[%s2127_s22 + $0xa0] sm:$0xff] }
  0x4d   : > { %911 = vperm.xlu0 %1960, %v828_v30   ;;  %v796_v30 = vld [vmem:[%s2127_s22 + $0x38] sm:$0xff] }
  0x4e   : > { %916 = vperm.xlu1 %1961, %v829_v31   ;;  %v810_v31 = vld [vmem:[%s2127_s22 + $0xa8] sm:$0xff] }
  0x51   : > { %921 = vperm.xlu0 %1960, %v830_v32   ;;  %v797_v32 = vld [vmem:[%s2127_s22 + $0x40] sm:$0xff] }
  0x52   : > { %926 = vperm.xlu1 %1961, %v831_v33   ;;  %v811_v33 = vld [vmem:[%s2127_s22 + $0xb0] sm:$0xff] }
  0x55   : > { %931 = vperm.xlu0 %1960, %v832_v34   ;;  %v798_v34 = vld [vmem:[%s2127_s22 + $0x48] sm:$0xff] }
  0x56   : > { %936 = vperm.xlu1 %1961, %v833_v35   ;;  %v812_v35 = vld [vmem:[%s2127_s22 + $0xb8] sm:$0xff] }
  0x59   : > { %941 = vperm.xlu0 %1960, %v834_v36   ;;  %v799_v36 = vld [vmem:[%s2127_s22 + $0x50] sm:$0xff] }
  0x5a   : > { %946 = vperm.xlu1 %1961, %v835_v37   ;;  %v813_v37 = vld [vmem:[%s2127_s22 + $0xc0] sm:$0xff] }
  0x5d   : > { %951 = vperm.xlu0 %1960, %v836_v38   ;;  %v800_v38 = vld [vmem:[%s2127_s22 + $0x58] sm:$0xff] }
  0x5e   : > { %956 = vperm.xlu1 %1961, %v837_v39   ;;  %v801_v39 = vld [vmem:[%s2127_s22 + $0x60] sm:$0xff] }
  0x61   : > { %961 = vperm.xlu0 %1960, %v838_v40   ;;  %v802_v40 = vld [vmem:[%s2127_s22 + $0x68] sm:$0xff] }
  0x62   : > { %1505 = vperm.xlu1 %1961, %v1773_v41  }
  0x9c   : > { %v555_v43 = vpop.permute.xlu0 %554 }
  0x9d   : > { %v545_v45 = vpop.permute.xlu1 %544 }
  0xa0   : > { %v550_v49 = vpop.permute.xlu0 %549 }
  0xa1   : > { %v540_v53 = vpop.permute.xlu1 %539 }
  0xa4   : > { %v685_v63 = vpop.permute.xlu0 %684 }
  0xa5   : > { %v680_v1 = vpop.permute.xlu1 %679 }
  0xa8   : > { %v675_v6 = vpop.permute.xlu0 %674 }
  0xa9   : > { %v670_v10 = vpop.permute.xlu1 %669 }
  0xac   : > { %v847_v41 = vpop.permute.xlu0 %846 }
  0xad   : > { %v852_v42 = vpop.permute.xlu1 %851 }
  0xe7   : > { %v1829_v44 = vpop.f32.mrf.mxu1 }
  0xe8   : > { %v642_v51 = vadd.f32 %v1829_v44, %v545_v45  ;;  %v857_v44 = vpop.permute.xlu1 %856 }
  0xe9   : > { %v636_v46 = vpop.f32.mrf.mxu1 }
  0xea   : > { %v637_v54 = vadd.f32 %v636_v46, %v540_v53 }
  0xeb   : > { %v1832_v47 = vpop.f32.mrf.mxu1 }
  0xec   : > { %v652_v48 = vadd.f32 %v1832_v47, %v555_v43  ;;  %v842_v43 = vpop.permute.xlu0 %841  ;;  %v2319_v46 = vpop.permute.xlu1 %866 }
  0xed   : > { %v646_v50 = vpop.f32.mrf.mxu1 }
  0xee   : > { %1962 = vtanh.f32 %v652_v48  ;;  %v647_v52 = vadd.f32 %v646_v50, %v550_v49 }
  0xf0   : > { %1964 = vtanh.f32 %v647_v52  ;;  %v862_v45 = vpop.permute.xlu0 %861  ;;  %v2323_v48 = vpop.permute.xlu1 %876 }
  0xf1   : > { %1966 = vtanh.f32 %v642_v51 }
  0xf2   : > { %1968 = vtanh.f32 %v637_v54 }
  0xf4   : > { %v2321_v47 = vpop.permute.xlu0 %871  ;;  %v2327_v50 = vpop.permute.xlu1 %886 }
  0xf8   : > { %v2325_v49 = vpop.permute.xlu0 %881  ;;  %v2331_v52 = vpop.permute.xlu1 %896 }
  0xfb   : > { %v1963_v55 = vpop.eup %1962 }
  0xfc   : > { %1833 = vmatprep.subr.mxu1 %v1963_v55  ;;  %v2329_v51 = vpop.permute.xlu0 %891 }
  0xfd   : > { %v1965_v56 = vpop.eup %1964  ;;  %1834 = vmatpush3.msra.mxu1 %v1963_v55 }
  0xfe   : > { %1835 = vmatprep.subr.mxu1 %v1965_v56  ;;  %v1967_v57 = vpop.eup %1966 }
  0xff   : > { %1836 = vmatpush3.msra.mxu1 %v1965_v56  ;;  %v1969_v58 = vpop.eup %1968  ;;  %v2337_v56 = vpop.permute.xlu1 %906 }
 0x100   : > { %1837 = vmatprep.subr.mxu1 %v1967_v57  ;;  %v2333_v53 = vpop.permute.xlu0 %901 }
 0x101   : > { %1838 = vmatpush3.msra.mxu1 %v1967_v57 }
 0x102   : > { %1839 = vmatprep.subr.mxu1 %v1969_v58 }
 0x103   : > { %1840 = vmatpush3.msra.mxu1 %v1969_v58 }
 0x104   : > { %1842 = vmatmul.mubr.msk.f32.vlgmr.msra.gmra.mxu1 %vm687_vm3, %v660_v59  ;;  %1930 = vmatprep.subr.mxu1 %v2025_v62  ;;  %v2339_v59 = vpop.permute.xlu0 %911 }
 0x105   : > { %1844 = vmatprep.mubr.msk.f32.mxu1 %vm687_vm3, %v661_v60 }
 0x108   : > { %1845 = vmatmul.mubr.msk.f32.gmra.mxu1 %vm687_vm3, %v662_v61 }
 0x109   : > { %1897 = vmatprep.mubr.msk.f32.mxu1 %vm2026_vm4, %v2025_v62 }
 0x1c4   : > { %v1843_v0 = vpop.f32.mrf.mxu1 }
 0x1c5   : > { %v772_v8 = vadd.f32 %v1843_v0, %v675_v6 }
 0x1c6   : > { %v766_v3 = vpop.f32.mrf.mxu1 }
 0x1c7   : > { %v767_v11 = vadd.f32 %v766_v3, %v670_v10 }
 0x1c8   : > { %v1846_v4 = vpop.f32.mrf.mxu1 }
 0x1c9   : > { %v782_v5 = vadd.f32 %v1846_v4, %v685_v63 }
 0x1ca   : > { %v776_v7 = vpop.f32.mrf.mxu1 }
 0x1cb   : > { %1970 = vtanh.f32 %v782_v5  ;;  %v777_v9 = vadd.f32 %v776_v7, %v680_v1  ;;  %v917_v1 = vpop.permute.xlu1 %916  ;;  %v922_v7 = vpop.permute.xlu0 %921 }
 0x1cd   : > { %1972 = vtanh.f32 %v777_v9 }
 0x1ce   : > { %1974 = vtanh.f32 %v772_v8  ;;  %v2346_v8 = vmul.f32 %v2153_v2, %v2153_v2 }
 0x1cf   : > { %1976 = vtanh.f32 %v767_v11 }
 0x1d8   : > { %v1971_v12 = vpop.eup %1970 }
 0x1d9   : > { %1848 = vmatpush3.msra.mxu0 %v1971_v12  ;;  %1934 = vmatpush3.msra.mxu1 %v1971_v12 }
 0x1da   : > { %v1973_v13 = vpop.eup %1972  ;;  %1849 = vmatprep.subr.mxu0 %v2025_v62  ;;  %1931 = vmatprep.subr.mxu1 %v2025_v62 }
 0x1db   : > { %1850 = vmatpush3.msra.mxu0 %v1973_v13  ;;  %1935 = vmatpush3.msra.mxu1 %v1973_v13  ;;  %v1975_v14 = vpop.eup %1974 }
 0x1dc   : > { %1851 = vmatprep.subr.mxu0 %v2025_v62  ;;  %1932 = vmatprep.subr.mxu1 %v2025_v62  ;;  %v1977_v17 = vpop.eup %1976 }
 0x1dd   : > { %1852 = vmatpush3.msra.mxu0 %v1975_v14  ;;  %1936 = vmatpush3.msra.mxu1 %v1975_v14 }
 0x1de   : > { %1853 = vmatprep.subr.mxu0 %v2025_v62  ;;  %1933 = vmatprep.subr.mxu1 %v2025_v62 }
 0x1df   : > { %1854 = vmatpush3.msra.mxu0 %v1977_v17  ;;  %1937 = vmatpush3.msra.mxu1 %v1977_v17 }
 0x1e0   : > { %1856 = vmatmul.mubr.msk.f32.vlgmr.msra.gmra.mxu0 %vm687_vm3, %v789_v15  ;;  %1898 = vmatmul.mubr.msk.f32.vlgmr.msra.gmra.mxu1 %vm687_vm3, %v803_v16 }
 0x1e1   : > { %1858 = vmatprep.mubr.msk.f32.mxu0 %vm2026_vm4, %v2025_v62  ;;  %1900 = vmatprep.mubr.msk.f32.mxu1 %vm2026_vm4, %v2025_v62 }
 0x1e4   : > { %1859 = vmatmul.mubr.msk.f32.gmra.mxu0 %vm687_vm3, %v790_v18  ;;  %1901 = vmatmul.mubr.msk.f32.gmra.mxu1 %vm687_vm3, %v804_v19  ;;  %v927_v19 = vpop.permute.xlu1 %926 }
 0x1e5   : > { %1861 = vmatprep.mubr.msk.f32.mxu0 %vm2026_vm4, %v2025_v62  ;;  %1903 = vmatprep.mubr.msk.f32.mxu1 %vm2026_vm4, %v2025_v62 }
 0x1e8   : > { %1862 = vmatmul.mubr.msk.f32.gmra.mxu0 %vm687_vm3, %v791_v20  ;;  %1904 = vmatmul.mubr.msk.f32.gmra.mxu1 %vm687_vm3, %v805_v21  ;;  %v2359_v20 = vmul.f32 %v2346_v8, %v2153_v2 }
 0x1e9   : > { %1864 = vmatprep.mubr.msk.f32.mxu0 %vm2026_vm4, %v2025_v62  ;;  %1906 = vmatprep.mubr.msk.f32.mxu1 %vm2026_vm4, %v2025_v62 }
 0x1ec   : > { %1865 = vmatmul.mubr.msk.f32.gmra.mxu0 %vm687_vm3, %v792_v22  ;;  %1907 = vmatmul.mubr.msk.f32.gmra.mxu1 %vm687_vm3, %v806_v23 }
 0x1ed   : > { %1867 = vmatprep.mubr.msk.f32.mxu0 %vm2026_vm4, %v2025_v62  ;;  %1909 = vmatprep.mubr.msk.f32.mxu1 %vm2026_vm4, %v2025_v62 }
 0x1f0   : > { %1868 = vmatmul.mubr.msk.f32.gmra.mxu0 %vm687_vm3, %v793_v24  ;;  %1910 = vmatmul.mubr.msk.f32.gmra.mxu1 %vm687_vm3, %v807_v25 }
 0x1f1   : > { %1870 = vmatprep.mubr.msk.f32.mxu0 %vm2026_vm4, %v2025_v62  ;;  %1912 = vmatprep.mubr.msk.f32.mxu1 %vm2026_vm4, %v2025_v62 }
 0x1f4   : > { %1871 = vmatmul.mubr.msk.f32.gmra.mxu0 %vm687_vm3, %v794_v26  ;;  %1913 = vmatmul.mubr.msk.f32.gmra.mxu1 %vm687_vm3, %v808_v27 }
 0x1f5   : > { %1873 = vmatprep.mubr.msk.f32.mxu0 %vm2026_vm4, %v2025_v62  ;;  %1915 = vmatprep.mubr.msk.f32.mxu1 %vm2026_vm4, %v2025_v62 }
 0x1f8   : > { %1874 = vmatmul.mubr.msk.f32.gmra.mxu0 %vm687_vm3, %v795_v28  ;;  %1916 = vmatmul.mubr.msk.f32.gmra.mxu1 %vm687_vm3, %v809_v29 }
 0x1f9   : > { %1876 = vmatprep.mubr.msk.f32.mxu0 %vm2026_vm4, %v2025_v62  ;;  %1918 = vmatprep.mubr.msk.f32.mxu1 %vm2026_vm4, %v2025_v62 }
 0x1fc   : > { %1877 = vmatmul.mubr.msk.f32.gmra.mxu0 %vm687_vm3, %v796_v30  ;;  %1919 = vmatmul.mubr.msk.f32.gmra.mxu1 %vm687_vm3, %v810_v31 }
 0x1fd   : > { %1879 = vmatprep.mubr.msk.f32.mxu0 %vm2026_vm4, %v2025_v62  ;;  %1921 = vmatprep.mubr.msk.f32.mxu1 %vm2026_vm4, %v2025_v62 }
 0x200   : > { %1880 = vmatmul.mubr.msk.f32.gmra.mxu0 %vm687_vm3, %v797_v32  ;;  %1922 = vmatmul.mubr.msk.f32.gmra.mxu1 %vm687_vm3, %v811_v33  ;;  %v932_v32 = vpop.permute.xlu0 %931  ;;  %v2374_v33 = vmul.f32 %v2359_v20, %v2153_v2 }
 0x201   : > { %1882 = vmatprep.mubr.msk.f32.mxu0 %vm2026_vm4, %v2025_v62  ;;  %1924 = vmatprep.mubr.msk.f32.mxu1 %vm2026_vm4, %v2025_v62 }
 0x204   : > { %1883 = vmatmul.mubr.msk.f32.gmra.mxu0 %vm687_vm3, %v798_v34  ;;  %1925 = vmatmul.mubr.msk.f32.gmra.mxu1 %vm687_vm3, %v812_v35 }
 0x205   : > { %1885 = vmatprep.mubr.msk.f32.mxu0 %vm2026_vm4, %v2025_v62  ;;  %1927 = vmatprep.mubr.msk.f32.mxu1 %vm2026_vm4, %v2025_v62 }
 0x208   : > { %1886 = vmatmul.mubr.msk.f32.gmra.mxu0 %vm687_vm3, %v799_v36  ;;  %1928 = vmatmul.mubr.msk.f32.gmra.mxu1 %vm687_vm3, %v813_v37 }
 0x209   : > { %1888 = vmatprep.mubr.msk.f32.mxu0 %vm2026_vm4, %v2025_v62 }
 0x20c   : > { %1889 = vmatmul.mubr.msk.f32.gmra.mxu0 %vm687_vm3, %v800_v38 }
 0x20d   : > { %1891 = vmatprep.mubr.msk.f32.mxu0 %vm2026_vm4, %v2025_v62 }
 0x210   : > { %1892 = vmatmul.mubr.msk.f32.gmra.mxu0 %vm687_vm3, %v801_v39 }
 0x211   : > { %1894 = vmatprep.mubr.msk.f32.mxu0 %vm2026_vm4, %v2025_v62 }
 0x214   : > { %1895 = vmatmul.mubr.msk.f32.gmra.mxu0 %vm687_vm3, %v802_v40 }
 0x2a0   : > { %v1105_v54 = vpop.f32.mrf.mxu0  ;;  %v2335_v55 = vpop.f32.mrf.mxu1 }
 0x2a1   : > { %v1106_v3 = vadd.f32 %v1105_v54, %v842_v43 }
 0x2a2   : > { %v1857_v57 = vpop.f32.mrf.mxu0  ;;  %v1899_v58 = vpop.f32.mrf.mxu1 }
 0x2a3   : > { %v1242_v37 = vmul.f32 %v1106_v3, %v1106_v3 }
 0x2a4   : > { %v1110_v60 = vpop.f32.mrf.mxu0  ;;  %v1180_v61 = vpop.f32.mrf.mxu1 }
 0x2a5   : > { %v1111_v62 = vadd.f32 %v1110_v60, %v847_v41  ;;  %v2352_v15 = vadd.f32 %v1180_v61, %v917_v1 }
 0x2a6   : > { %v1860_v63 = vpop.f32.mrf.mxu0  ;;  %v1902_v0 = vpop.f32.mrf.mxu1 }
 0x2a7   : > { %v2342_v4 = vmul.f32 %v1111_v62, %v2153_v2 }
 0x2a8   : > { %v1115_v5 = vpop.f32.mrf.mxu0  ;;  %v1185_v6 = vpop.f32.mrf.mxu1 }
 0x2a9   : > { %v1236_v9 = vadd.f32 %v2342_v4, %v1106_v3  ;;  %v1116_v10 = vadd.f32 %v1115_v5, %v852_v42  ;;  %v1186_v11 = vadd.f32 %v1185_v6, %v922_v7  ;;  %v1244_v34 = vmul.f32 %v2342_v4, %v1106_v3 }
 0x2aa   : > { %v1863_v12 = vpop.f32.mrf.mxu0  ;;  %v1905_v13 = vpop.f32.mrf.mxu1  ;;  %v1255_v5 = vmul.f32 %v2342_v4, %v2342_v4 }
 0x2ab   : > { %v2350_v14 = vmul.f32 %v2346_v8, %v1116_v10  ;;  %v2355_v16 = vmul.f32 %v1186_v11, %v2153_v2  ;;  %v1245_v60 = vadd.f32 %v1244_v34, %v1242_v37 }
 0x2ac   : > { %v1120_v17 = vpop.f32.mrf.mxu0  ;;  %v1190_v18 = vpop.f32.mrf.mxu1 }
 0x2ad   : > { %v1237_v21 = vadd.f32 %v1236_v9, %v2350_v14  ;;  %v1395_v22 = vadd.f32 %v2355_v16, %v2352_v15  ;;  %v2366_v23 = vmul.f32 %v2355_v16, %v2352_v15  ;;  %v1121_v24 = vadd.f32 %v1120_v17, %v857_v44  ;;  %v937_v17 = vpop.permute.xlu1 %936 }
 0x2ae   : > { %v1866_v25 = vpop.f32.mrf.mxu0  ;;  %v1908_v26 = vpop.f32.mrf.mxu1  ;;  %v1246_v27 = vmul.f32 %v2350_v14, %v1106_v3  ;;  %v1191_v28 = vadd.f32 %v1190_v18, %v927_v19  ;;  %v1258_v18 = vmul.f32 %v2350_v14, %v2342_v4 }
 0x2af   : > { %v2370_v29 = vmul.f32 %v2359_v20, %v1121_v24  ;;  %v1256_v25 = vmul.f32 0.33333334, %v1255_v5 }
 0x2b0   : > { %v1125_v30 = vpop.f32.mrf.mxu0  ;;  %v1195_v31 = vpop.f32.mrf.mxu1  ;;  %v2378_v35 = vmul.f32 %v2346_v8, %v1191_v28  ;;  %v1247_v43 = vmul.f32 0.6666667, %v1246_v27  ;;  %v1259_v37 = vmul.f32 0.5, %v1258_v18 }
 0x2b1   : > { %v1126_v36 = vadd.f32 %v1125_v30, %v862_v45  ;;  %v1238_v38 = vadd.f32 %v1237_v21, %v2370_v29  ;;  %v1249_v39 = vmul.f32 %v2370_v29, %v1106_v3  ;;  %v1196_v40 = vadd.f32 %v1195_v31, %v932_v32 }
 0x2b2   : > { %v1869_v41 = vpop.f32.mrf.mxu0  ;;  %v1911_v42 = vpop.f32.mrf.mxu1  ;;  %v1396_v44 = vadd.f32 %v1395_v22, %v2378_v35  ;;  %v2385_v54 = vmul.f32 %v2378_v35, %v2352_v15  ;;  %v2389_v57 = vmul.f32 %v2378_v35, %v2355_v16  ;;  %v1248_v6 = vadd.f32 %v1247_v43, %v1245_v60 }
 0x2b3   : > { %v1250_v61 = vmul.f32 0.5, %v1249_v39  ;;  %v2392_v62 = vmul.f32 %v2374_v33, %v1126_v36  ;;  %v2395_v63 = vmul.f32 %v2359_v20, %v1196_v40  ;;  %v1261_v26 = vmul.f32 %v2370_v29, %v2342_v4  ;;  %v942_v36 = vpop.permute.xlu0 %941  ;;  %v947_v60 = vpop.permute.xlu1 %946 }
 0x2b4   : > { %v1130_v45 = vpop.f32.mrf.mxu0  ;;  %v1200_v58 = vpop.f32.mrf.mxu1  ;;  %v1267_v41 = vmul.f32 %v2350_v14, %v2350_v14  ;;  %v1270_v42 = vmul.f32 %v2370_v29, %v2350_v14 }
 0x2b5   : > { %v2400_v7 = vadd.f32 %v1238_v38, %v2392_v62  ;;  %v1252_v9 = vmul.f32 %v2392_v62, %v1106_v3  ;;  %v2404_v10 = vadd.f32 %v1396_v44, %v2395_v63  ;;  %v2408_v11 = vmul.f32 %v2395_v63, %v2352_v15 }
 0x2b6   : > { %v1872_v0 = vpop.f32.mrf.mxu0  ;;  %v1914_v1 = vpop.f32.mrf.mxu1  ;;  %v1251_v19 = vadd.f32 %v1250_v61, %v1248_v6  ;;  %v2414_v22 = vmul.f32 %v2395_v63, %v2355_v16  ;;  %v2420_v28 = vmul.f32 %v2395_v63, %v2378_v35  ;;  %v1201_v30 = vadd.f32 %v1200_v58, %v937_v17 }
 0x2b7   : > { %v1253_v21 = vmul.f32 0.4, %v1252_v9  ;;  %v1264_v39 = vmul.f32 %v2392_v62, %v2342_v4  ;;  %v1262_v61 = vmul.f32 0.4, %v1261_v26  ;;  %v2437_v4 = vadd.f32 %v1130_v45, %v2319_v46 }
 0x2b8   : > { %v1135_v12 = vpop.f32.mrf.mxu0  ;;  %v1205_v13 = vpop.f32.mrf.mxu1  ;;  %v2431_v43 = vmul.f32 %v2374_v33, %v1201_v30 }
 0x2b9   : > { %v1254_v27 = vadd.f32 %v1253_v21, %v1251_v19  ;;  %v1136_v31 = vadd.f32 %v1135_v12, %v2321_v47  ;;  %v1265_v17 = vmul.f32 0.33333334, %v1264_v39 }
 0x2ba   : > { %v1875_v3 = vpop.f32.mrf.mxu0  ;;  %v1917_v24 = vpop.f32.mrf.mxu1  ;;  %v2444_v1 = vmul.f32 %v2431_v43, %v2352_v15  ;;  %v2448_v5 = vmul.f32 %v2431_v43, %v2355_v16  ;;  %v2452_v6 = vmul.f32 %v2431_v43, %v2378_v35  ;;  %v2456_v9 = vmul.f32 %v2431_v43, %v2395_v63 }
 0x2bb   : > { %v1257_v38 = vadd.f32 %v1256_v25, %v1254_v27  ;;  %v2434_v47 = vmul.f32 %v1136_v31, %v2153_v2  ;;  %v952_v24 = vpop.permute.xlu0 %951  ;;  %v1268_v25 = vmul.f32 0.2, %v1267_v41  ;;  %v1273_v27 = vmul.f32 %v2392_v62, %v2350_v14 }
 0x2bc   : > { %v1140_v32 = vpop.f32.mrf.mxu0  ;;  %v1210_v34 = vpop.f32.mrf.mxu1  ;;  %v1271_v31 = vmul.f32 0.33333334, %v1270_v42  ;;  %v1279_v14 = vmul.f32 %v2392_v62, %v2370_v29 }
 0x2bd   : > { %v1141_v40 = vadd.f32 %v1140_v32, %v2323_v48  ;;  %v1260_v0 = vadd.f32 %v1259_v37, %v1257_v38  ;;  %v1289_v18 = vadd.f32 %v2434_v47, %v2437_v4  ;;  %v1211_v19 = vadd.f32 %v1210_v34, %v947_v60 }
 0x2be   : > { %v1878_v44 = vpop.f32.mrf.mxu0  ;;  %v1920_v58 = vpop.f32.mrf.mxu1  ;;  %v1276_v32 = vmul.f32 %v2370_v29, %v2370_v29  ;;  %v2465_v37 = vadd.f32 %v1205_v13, %v942_v36 }
 0x2bf   : > { %v2440_v48 = vmul.f32 %v2346_v8, %v1141_v40  ;;  %v1263_v12 = vadd.f32 %v1262_v61, %v1260_v0  ;;  %v2468_v34 = vmul.f32 %v1211_v19, %v2153_v2  ;;  %v1274_v0 = vmul.f32 0.2857143, %v1273_v27 }
 0x2c0   : > { %v1145_v46 = vpop.f32.mrf.mxu0  ;;  %v1215_v45 = vpop.f32.mrf.mxu1 }
 0x2c1   : > { %v1266_v26 = vadd.f32 %v1265_v17, %v1263_v12  ;;  %v1290_v30 = vadd.f32 %v1289_v18, %v2440_v48  ;;  %v1146_v41 = vadd.f32 %v1145_v46, %v2325_v49  ;;  %v1216_v44 = vadd.f32 %v1215_v45, %v952_v24  ;;  %v957_v24 = vpop.permute.xlu1 %956 }
 0x2c2   : > { %v1881_v21 = vpop.f32.mrf.mxu0  ;;  %v1923_v3 = vpop.f32.mrf.mxu1  ;;  %v1448_v13 = vadd.f32 %v2468_v34, %v2465_v37  ;;  %v2478_v36 = vmul.f32 %v2468_v34, %v2465_v37  ;;  %v1282_v17 = vmul.f32 %v2392_v62, %v2392_v62 }
 0x2c3   : > { %v1269_v40 = vadd.f32 %v1268_v25, %v1266_v26  ;;  %v2481_v12 = vmul.f32 %v2359_v20, %v1146_v41  ;;  %v2484_v49 = vmul.f32 %v2346_v8, %v1216_v44  ;;  %v1280_v26 = vmul.f32 0.25, %v1279_v14 }
 0x2c4   : > { %v1150_v38 = vpop.f32.mrf.mxu0  ;;  %v1220_v39 = vpop.f32.mrf.mxu1  ;;  %v1283_v41 = vmul.f32 0.11111111, %v1282_v17  ;;  %v1299_v14 = vmul.f32 %v2440_v48, %v2437_v4 }
 0x2c5   : > { %v1151_v58 = vadd.f32 %v1150_v38, %v2327_v50  ;;  %v1272_v61 = vadd.f32 %v1271_v31, %v1269_v40  ;;  %v1277_v50 = vmul.f32 0.14285715, %v1276_v32  ;;  %v1291_v19 = vadd.f32 %v1290_v30, %v2481_v12  ;;  %v962_v40 = vpop.permute.xlu0 %961 }
 0x2c6   : > { %v1884_v42 = vpop.f32.mrf.mxu0  ;;  %v1926_v60 = vpop.f32.mrf.mxu1  ;;  %v2493_v27 = vadd.f32 %v1448_v13, %v2484_v49  ;;  %v2497_v31 = vmul.f32 %v2484_v49, %v2465_v37  ;;  %v2501_v62 = vmul.f32 %v2484_v49, %v2468_v34  ;;  %v1221_v32 = vadd.f32 %v1220_v39, %v957_v24 }
 0x2c7   : > { %v1275_v45 = vadd.f32 %v1274_v0, %v1272_v61  ;;  %v2489_v18 = vmul.f32 %v2374_v33, %v1151_v58  ;;  %v1295_v61 = vmul.f32 %v2437_v4, %v2437_v4  ;;  %v1302_v0 = vmul.f32 %v2481_v12, %v2437_v4 }
 0x2c8   : > { %v1155_v29 = vpop.f32.mrf.mxu0  ;;  %v1225_v46 = vpop.f32.mrf.mxu1  ;;  %v2511_v39 = vmul.f32 %v2359_v20, %v1221_v32  ;;  %v1300_v17 = vmul.f32 0.6666667, %v1299_v14 }
 0x2c9   : > { %v1278_v25 = vadd.f32 %v1277_v50, %v1275_v45  ;;  %v1292_v44 = vadd.f32 %v1291_v19, %v2489_v18  ;;  %v1226_v58 = vadd.f32 %v1225_v46, %v962_v40  ;;  %v1297_v45 = vmul.f32 %v2434_v47, %v2437_v4 }
 0x2ca   : > { %v1887_v21 = vpop.f32.mrf.mxu0  ;;  %v1929_v3 = vpop.f32.mrf.mxu1  ;;  %v2517_v46 = vmul.f32 %v2511_v39, %v2465_v37  ;;  %v2521_v19 = vmul.f32 %v2511_v39, %v2468_v34  ;;  %v1308_v40 = vmul.f32 %v2434_v47, %v2434_v47 }
 0x2cb   : > { %v1281_v30 = vadd.f32 %v1280_v26, %v1278_v25  ;;  %v2524_v21 = vmul.f32 %v2374_v33, %v1226_v58  ;;  %v1305_v25 = vmul.f32 %v2489_v18, %v2437_v4 }
 0x2cc   : > { %v1160_v38 = vpop.f32.mrf.mxu0 }
 0x2cd   : > { %v1284_v60 = vadd.f32 %v1283_v41, %v1281_v30  ;;  %v1161_v26 = vadd.f32 %v1160_v38, %v2331_v52  ;;  %v1303_v30 = vmul.f32 0.5, %v1302_v0  ;;  %v2533_v41 = vadd.f32 %v1155_v29, %v2329_v51 }
 0x2ce   : > { %v1890_v42 = vpop.f32.mrf.mxu0  ;;  %v2537_v14 = vmul.f32 %v2524_v21, %v2465_v37  ;;  %v2541_v4 = vmul.f32 %v2524_v21, %v2468_v34  ;;  %v2552_v29 = vmul.f32 %v2511_v39, %v2484_v49  ;;  %v1306_v0 = vmul.f32 0.4, %v1305_v25 }
 0x2cf   : > { %v1296_v50 = vadd.f32 %v1295_v61, %v1284_v60  ;;  %v2544_v52 = vmul.f32 %v1161_v26, %v2153_v2  ;;  %v1311_v60 = vmul.f32 %v2440_v48, %v2434_v47  ;;  %v1309_v2 = vmul.f32 0.33333334, %v1308_v40 }
 0x2d0   : > { %v1165_v13 = vpop.f32.mrf.mxu0  ;;  %v1317_v25 = vmul.f32 %v2489_v18, %v2434_v47  ;;  %v1320_v26 = vmul.f32 %v2440_v48, %v2440_v48 }
 0x2d1   : > { %v1298_v24 = vadd.f32 %v1297_v45, %v1296_v50  ;;  %v1166_v32 = vadd.f32 %v1165_v13, %v2333_v53  ;;  %v1342_v13 = vadd.f32 %v2544_v52, %v2533_v41 }
 0x2d2   : > { %v1893_v3 = vpop.f32.mrf.mxu0 }
 0x2d3   : > { %v1301_v42 = vadd.f32 %v1300_v17, %v1298_v24  ;;  %v2547_v53 = vmul.f32 %v2346_v8, %v1166_v32  ;;  %v1314_v8 = vmul.f32 %v2481_v12, %v2434_v47  ;;  %v1176_v17 = vadd.f32 %v2335_v55, %v2339_v59 }
 0x2d4   : > { %v1170_v58 = vpop.f32.mrf.mxu0  ;;  %v1312_v3 = vmul.f32 0.5, %v1311_v60  ;;  %v1293_v32 = vmul.f32 %v1292_v44, %v1292_v44  ;;  %v1323_v59 = vmul.f32 %v2481_v12, %v2440_v48  ;;  %v1321_v44 = vmul.f32 0.2, %v1320_v26 }
 0x2d5   : > { %v1171_v38 = vadd.f32 %v1170_v58, %v2337_v56  ;;  %v1304_v61 = vadd.f32 %v1303_v30, %v1301_v42  ;;  %v1343_v56 = vadd.f32 %v1342_v13, %v2547_v53  ;;  %v1315_v30 = vmul.f32 0.4, %v1314_v8 }
 0x2d6   : > { %v1896_v51 = vpop.f32.mrf.mxu0  ;;  %v2575_v42 = vmul.f32 %v2524_v21, %v2484_v49  ;;  %v2578_v55 = vmul.f32 %v2374_v33, %v1176_v17  ;;  %v1398_v33 = vadd.f32 %v2404_v10, %v2431_v43  ;;  %v1329_v13 = vmul.f32 %v2481_v12, %v2481_v12 }
 0x2d7   : > { %v1307_v50 = vadd.f32 %v1306_v0, %v1304_v61  ;;  %v2562_v45 = vmul.f32 %v2359_v20, %v1171_v38  ;;  %v1240_v20 = vmul.f32 %v2400_v7, %v2400_v7  ;;  %v1318_v38 = vmul.f32 0.33333334, %v1317_v25 }
 0x2d8   : > { %v2584_v51 = vmul.f32 %v2524_v21, %v2511_v39  ;;  %v1326_v7 = vmul.f32 %v2489_v18, %v2440_v48  ;;  %v1324_v8 = vmul.f32 0.33333334, %v1323_v59  ;;  %v1332_v17 = vmul.f32 %v2489_v18, %v2481_v12 }
 0x2d9   : > { %v1310_v24 = vadd.f32 %v1309_v2, %v1307_v50  ;;  %v1344_v40 = vadd.f32 %v1343_v56, %v2562_v45  ;;  %v1294_v60 = vadd.f32 %v1293_v32, %v1240_v20  ;;  %v1450_v2 = vadd.f32 %v2493_v27, %v2511_v39 }
 0x2da   : > { %v1399_v26 = vmul.f32 %v1398_v33, %v1398_v33  ;;  %v1330_v32 = vmul.f32 0.14285715, %v1329_v13  ;;  %v1333_v20 = vmul.f32 0.25, %v1332_v17  ;;  %v1364_v17 = vmul.f32 %v2547_v53, %v2544_v52 }
 0x2db   : > { %v1313_v58 = vadd.f32 %v1312_v3, %v1310_v24  ;;  %v1345_v0 = vadd.f32 %v1344_v40, %v2578_v55  ;;  %v1451_v3 = vadd.f32 %v1450_v2, %v2524_v21  ;;  %v1327_v24 = vmul.f32 0.2857143, %v1326_v7 }
 0x2dc   : > { %v1335_v40 = vmul.f32 %v2489_v18, %v2489_v18  ;;  %v1350_v7 = vmul.f32 %v2544_v52, %v2533_v41  ;;  %v1355_v18 = vmul.f32 %v2562_v45, %v2533_v41  ;;  %v1361_v2 = vmul.f32 %v2544_v52, %v2544_v52 }
 0x2dd   : > { %v1316_v47 = vadd.f32 %v1315_v30, %v1313_v58  ;;  %v1346_v56 = vmul.f32 %v1345_v0, %v1345_v0  ;;  %v1452_v58 = vmul.f32 %v1451_v3, %v1451_v3  ;;  %v1358_v0 = vmul.f32 %v2578_v55, %v2533_v41 }
 0x2df   : > { %v1319_v61 = vadd.f32 %v1318_v38, %v1316_v47  ;;  %v1347_v25 = vadd.f32 %v1346_v56, %v1294_v60  ;;  %v1336_v38 = vmul.f32 0.11111111, %v1335_v40  ;;  %v1352_v60 = vmul.f32 %v2547_v53, %v2533_v41 }
 0x2e0   : > { %v1359_v56 = vmul.f32 0.4, %v1358_v0  ;;  %v1388_v0 = vmul.f32 %v2578_v55, %v2578_v55 }
 0x2e1   : > { %v1322_v50 = vadd.f32 %v1321_v44, %v1319_v61  ;;  %v1400_v30 = vadd.f32 %v1399_v26, %v1347_v25  ;;  %v1348_v44 = vmul.f32 %v2533_v41, %v2533_v41  ;;  %v1353_v13 = vmul.f32 0.6666667, %v1352_v60 }
 0x2e2   : > { %v1367_v25 = vmul.f32 %v2562_v45, %v2544_v52  ;;  %v1370_v41 = vmul.f32 %v2578_v55, %v2544_v52  ;;  %v1365_v26 = vmul.f32 0.5, %v1364_v17  ;;  %v1382_v52 = vmul.f32 %v2562_v45, %v2562_v45 }
 0x2e3   : > { %v1325_v48 = vadd.f32 %v1324_v8, %v1322_v50  ;;  %v2600_v59 = vadd.f32 %v1452_v58, %v1400_v30  ;;  %v1356_v50 = vmul.f32 0.5, %v1355_v18  ;;  %v1385_v18 = vmul.f32 %v2578_v55, %v2562_v45 }
 0x2e4   : > { %v1368_v30 = vmul.f32 0.4, %v1367_v25  ;;  %v1371_v58 = vmul.f32 0.33333334, %v1370_v41  ;;  %v1412_v41 = vmul.f32 0.4, %v2444_v1  ;;  %v1435_v1 = vmul.f32 %v2395_v63, %v2395_v63 }
 0x2e5   : > { %v1328_v10 = vadd.f32 %v1327_v24, %v1325_v48  ;;  %v1362_v48 = vmul.f32 0.33333334, %v1361_v2  ;;  %v1459_v63 = vmul.f32 0.6666667, %v2497_v31 }
 0x2e7   : > { %v1331_v27 = vadd.f32 %v1330_v32, %v1328_v10  ;;  %v1373_v10 = vmul.f32 %v2547_v53, %v2547_v53 }
 0x2e9   : > { %v1334_v47 = vadd.f32 %v1333_v20, %v1331_v27  ;;  %v1376_v20 = vmul.f32 %v2562_v45, %v2547_v53  ;;  %v1414_v45 = vmul.f32 %v2355_v16, %v2355_v16 }
 0x2eb   : > { %v1337_v12 = vadd.f32 %v1336_v38, %v1334_v47  ;;  %v1374_v47 = vmul.f32 0.2, %v1373_v10  ;;  %v1379_v38 = vmul.f32 %v2578_v55, %v2547_v53  ;;  %v1377_v60 = vmul.f32 0.33333334, %v1376_v20 }
 0x2ec   : > { %v1409_v55 = vmul.f32 0.5, %v2408_v11  ;;  %v1430_v20 = vmul.f32 0.33333334, %v2420_v28  ;;  %v1454_v28 = vmul.f32 %v2465_v37, %v2465_v37 }
 0x2ed   : > { %v1349_v61 = vadd.f32 %v1348_v44, %v1337_v12 }
 0x2ef   : > { %v1351_v33 = vadd.f32 %v1350_v7, %v1349_v61  ;;  %v1380_v61 = vmul.f32 0.2857143, %v1379_v38 }
 0x2f1   : > { %v1354_v8 = vadd.f32 %v1353_v13, %v1351_v33  ;;  %v1383_v13 = vmul.f32 0.14285715, %v1382_v52 }
 0x2f3   : > { %v1357_v3 = vadd.f32 %v1356_v50, %v1354_v8  ;;  %v1386_v8 = vmul.f32 0.25, %v1385_v18  ;;  %v1389_v50 = vmul.f32 0.11111111, %v1388_v0  ;;  %v1467_v18 = vmul.f32 %v2468_v34, %v2468_v34 }
 0x2f4   : > { %v1477_v34 = vmul.f32 0.33333334, %v2541_v4 }
 0x2f5   : > { %v1360_v24 = vadd.f32 %v1359_v56, %v1357_v3  ;;  %v1401_v56 = vmul.f32 %v2352_v15, %v2352_v15 }
 0x2f7   : > { %v1363_v32 = vadd.f32 %v1362_v48, %v1360_v24  ;;  %v1406_v48 = vmul.f32 0.6666667, %v2385_v54  ;;  %v1421_v54 = vmul.f32 0.4, %v2414_v22 }
 0x2f9   : > { %v1366_v40 = vadd.f32 %v1365_v26, %v1363_v32  ;;  %v1415_v32 = vmul.f32 0.33333334, %v1414_v45  ;;  %v1494_v45 = vmul.f32 %v2524_v21, %v2524_v21 }
 0x2fb   : > { %v1369_v27 = vadd.f32 %v1368_v30, %v1366_v40  ;;  %v1418_v40 = vmul.f32 0.5, %v2389_v57  ;;  %v1426_v30 = vmul.f32 %v2378_v35, %v2378_v35  ;;  %v1433_v57 = vmul.f32 0.2857143, %v2452_v6 }
 0x2fc   : > { %v1441_v35 = vmul.f32 %v2431_v43, %v2431_v43  ;;  %v1462_v43 = vmul.f32 0.5, %v2517_v46 }
 0x2fd   : > { %v1372_v12 = vadd.f32 %v1371_v58, %v1369_v27  ;;  %v1424_v58 = vmul.f32 0.33333334, %v2448_v5  ;;  %v1427_v27 = vmul.f32 0.2, %v1426_v30 }
 0x2ff   : > { %v1375_v44 = vadd.f32 %v1374_v47, %v1372_v12  ;;  %v1436_v12 = vmul.f32 0.14285715, %v1435_v1 }
 0x301   : > { %v1378_v7 = vadd.f32 %v1377_v60, %v1375_v44  ;;  %v1439_v44 = vmul.f32 0.25, %v2456_v9  ;;  %v1442_v60 = vmul.f32 0.11111111, %v1441_v35  ;;  %v1465_v9 = vmul.f32 0.4, %v2537_v14 }
 0x302   : > { %v1483_v14 = vmul.f32 0.33333334, %v2552_v29 }
 0x303   : > { %v1381_v33 = vadd.f32 %v1380_v61, %v1378_v7 }
 0x305   : > { %v1384_v2 = vadd.f32 %v1383_v13, %v1381_v33  ;;  %v1468_v13 = vmul.f32 0.33333334, %v1467_v18 }
 0x307   : > { %v1387_v53 = vadd.f32 %v1386_v8, %v1384_v2  ;;  %v1471_v8 = vmul.f32 0.5, %v2501_v62  ;;  %v1486_v62 = vmul.f32 0.2857143, %v2575_v42 }
 0x309   : > { %v1390_v17 = vadd.f32 %v1389_v50, %v1387_v53  ;;  %v1474_v50 = vmul.f32 0.4, %v2521_v19 }
 0x30b   : > { %v1402_v3 = vadd.f32 %v1401_v56, %v1390_v17 }
 0x30d   : > { %v1404_v24 = vadd.f32 %v2366_v23, %v1402_v3  ;;  %v1488_v3 = vmul.f32 %v2511_v39, %v2511_v39 }
 0x30f   : > { %v1407_v25 = vadd.f32 %v1406_v48, %v1404_v24  ;;  %v1489_v19 = vmul.f32 0.14285715, %v1488_v3 }
 0x311   : > { %v1410_v26 = vadd.f32 %v1409_v55, %v1407_v25  ;;  %v1492_v55 = vmul.f32 0.25, %v2584_v51  ;;  %v1495_v25 = vmul.f32 0.11111111, %v1494_v45  ;;  %v1541_v51 = vld [vmem:[%s2147_s15] sm:$0xff] }
 0x313   : > { %v1413_v10 = vadd.f32 %v1412_v41, %v1410_v26  ;;  %v1986_v26 = vld [vmem:[#allocation2] sm:$0xff] }
 0x315   : > { %v1416_v15 = vadd.f32 %v1415_v32, %v1413_v10  ;;  %v1506_v32 = vpop.permute.xlu1 %1505 }
 0x317   : > { %v1419_v23 = vadd.f32 %v1418_v40, %v1416_v15 }
 0x319   : > { %v1422_v16 = vadd.f32 %v1421_v54, %v1419_v23 }
 0x31b   : > { %v1425_v11 = vadd.f32 %v1424_v58, %v1422_v16 }
 0x31d   : > { %v1428_v47 = vadd.f32 %v1427_v27, %v1425_v11  ;;  %v1530_v11 = vld [vmem:[%s2142_s20] sm:$0xff] }
 0x31f   : > { %v1431_v38 = vadd.f32 %v1430_v20, %v1428_v47 }
 0x321   : > { %v1434_v22 = vadd.f32 %v1433_v57, %v1431_v38  ;;  %v1531_v57 = vmul.f32 1.442695, %v1530_v11 }
 0x323   : > { %v1437_v5 = vadd.f32 %v1436_v12, %v1434_v22 }
 0x325   : > { %v1440_v52 = vadd.f32 %v1439_v44, %v1437_v5 }
 0x327   : > { %v1443_v61 = vadd.f32 %v1442_v60, %v1440_v52 }
 0x329   : > { %v1455_v7 = vadd.f32 %v1454_v28, %v1443_v61 }
 0x32b   : > { %v1457_v6 = vadd.f32 %v2478_v36, %v1455_v7  ;;  %v1479_v36 = vmul.f32 %v2484_v49, %v2484_v49 }
 0x32d   : > { %v1460_v0 = vadd.f32 %v1459_v63, %v1457_v6  ;;  %v1480_v46 = vmul.f32 0.2, %v1479_v36 }
 0x32f   : > { %v1463_v33 = vadd.f32 %v1462_v43, %v1460_v0 }
 0x331   : > { %v1466_v2 = vadd.f32 %v1465_v9, %v1463_v33 }
 0x333   : > { %v1469_v37 = vadd.f32 %v1468_v13, %v1466_v2 }
 0x335   : > { %v1472_v53 = vadd.f32 %v1471_v8, %v1469_v37 }
 0x337   : > { %v1475_v31 = vadd.f32 %v1474_v50, %v1472_v53  ;;  %v1564_v53 = vld [vmem:[#allocation3] sm:$0x1] }
 0x339   : > { %v1478_v56 = vadd.f32 %v1477_v34, %v1475_v31 }
 0x33b   : > { %v1481_v17 = vadd.f32 %v1480_v46, %v1478_v56 }
 0x33d   : > { %v1484_v48 = vadd.f32 %v1483_v14, %v1481_v17 }
 0x33f   : > { %v1487_v24 = vadd.f32 %v1486_v62, %v1484_v48 }
 0x341   : > { %v1490_v49 = vadd.f32 %v1489_v19, %v1487_v24 }
 0x343   : > { %v1493_v4 = vadd.f32 %v1492_v55, %v1490_v49 }
 0x345   : > { %v1496_v41 = vadd.f32 %v1495_v25, %v1493_v4 }
 0x347   : > { %v1498_v29 = vmul.f32 %v1986_v26, %v1496_v41 }
 0x349   : > { %v1508_v10 = vadd.f32 %v1506_v32, %v1498_v29 }
 0x34b   : > { %v1518_v39 = vsel %vm557_vm2, %v1508_v10, 0.0 }
 0x34c   : > { %1519 = vadd.xlane.f32.xlu0 %v1518_v39 }
 0x3d5   : > { %v1520_v42 = vpop.xlane.xlu0 %1519 }
 0x3d6   : > { %v1522_v40 = vmul.f32 0.125, %v1520_v42 }
 0x3d8   : > { %v1523_v15 = vsub.f32 %v1508_v10, %v1522_v40 }
 0x3da   : > { %v1524_v30 = vmul.f32 %v1523_v15, %v1523_v15 }
 0x3dc   : > { %v1525_v21 = vsel %vm557_vm2, %v1524_v30, 0.0 }
 0x3dd   : > { %1526 = vadd.xlane.f32.xlu1 %v1525_v21 }
 0x3ee   : > { %1544 = vperm.xlu1 %1961, %v1541_v51  }
 0x466   : > { %v1527_v54 = vpop.xlane.xlu1 %1526 }
 0x467   : > { %v1528_v23 = vmul.f32 0.125, %v1527_v54 }
 0x469   : > { %v1529_v58 = vadd.f32 1e-05, %v1528_v23 }
 0x46a   : > { %v1545_v63 = vpop.permute.xlu1 %1544 }
 0x46b   : > { %1978 = vlog2.f32 %v1529_v58 }
 0x46c   : > { %1980 = vpow2.f32 %v1531_v57 }
 0x46d   : > { %1982 = vrsqrt.f32 %v1529_v58 }
 0x46e   : > { %1984 = vlog2.f32 %v2600_v59 }
 0x478   : > { %v1979_v16 = vpop.eup %1978 }
 0x479   : > { %v1549_v27 = vmul.f32 0.6931472, %v1979_v16  ;;  %v1981_v38 = vpop.eup %1980 }
 0x47a   : > { %v1983_v44 = vpop.eup %1982 }
 0x47b   : > { %v1550_v20 = vmul.f32 0.5, %v1549_v27  ;;  %v1534_v60 = vmul.f32 %v1983_v44, %v1523_v15  ;;  %v1985_v43 = vpop.eup %1984 }
 0x47c   : > { %v1510_v0 = vmul.f32 0.6931472, %v1985_v43 }
 0x47d   : > { %v1551_v1 = vsub.f32 %v1530_v11, %v1550_v20 }
 0x47e   : > { %v1511_v9 = vsel %vm557_vm2, %v1510_v0, 0.0 }
 0x47f   : > { %v1553_v47 = vsel %vm1552_vm5, %v1551_v1, 0.0  ;;  %v1512_v33 = vrot.slane %v1511_v9, 4 }
 0x480   : > { %1554 = vadd.xlane.f32.xlu0 %v1553_v47 }
 0x481   : > { %v1513_v13 = vadd.f32 %v1512_v33, %v1511_v9 }
 0x483   : > { %v1514_v2 = vrot.slane %v1513_v13, 2 }
 0x485   : > { %v1515_v8 = vadd.f32 %v1514_v2, %v1513_v13 }
 0x487   : > { %v1516_v37 = vrot.slane %v1515_v8, 1 }
 0x489   : > { %v1517_v50 = vadd.f32 %v1516_v37, %v1515_v8 }
 0x48b   : > { %v1565_v36 = vadd.f32 %v1564_v53, %v1517_v50 }
 0x496   : > { %1537 = vperm.xlu0 %1960, %v1981_v38  }
 0x509   : > { %v1555_v12 = vpop.xlane.xlu0 %1554 }
 0x50a   : > { %v1556_v35 = vrot.slane %v1555_v12, 4 }
 0x50c   : > { %v1557_v22 = vadd.f32 %v1556_v35, %v1555_v12 }
 0x50e   : > { %v1558_v5 = vrot.slane %v1557_v22, 2 }
 0x510   : > { %v1559_v52 = vadd.f32 %v1558_v5, %v1557_v22 }
 0x511   : > { %v1538_v28 = vpop.permute.xlu0 %1537 }
 0x512   : > { %v1540_v61 = vmul.f32 %v1538_v28, %v1534_v60  ;;  %v1560_v7 = vrot.slane %v1559_v52, 1 }
 0x514   : > { %v1547_v6 = vadd.f32 %v1545_v63, %v1540_v61  ;;  %v1561_v18 = vadd.f32 %v1560_v7, %v1559_v52 }
 0x516   : > { %1563 = vst.msk [vmem:[#allocation2] sm:$0xff] %vm557_vm2, %v1547_v6 }
 0x517   : > { %1939 = vpush %v1561_v18 }
 0x548   : > { %s1940_s17 = spop %1939  ;;  %1573 = sbr.rel (%p1774_p5) target bundleno = 1365 (0x555), region = 68 }
 0x549   : > { %v1566_v31 = vstv %s1940_s17 }
 0x54a   : > { %v1567_v34 = vadd.f32 %v1566_v31, %v1565_v36 }
 0x54c   : > { %1569 = vst.msk [vmem:[#allocation3] sm:$0x1] %vm1568_vm6, %v1567_v34 }
 0x54d   : > { %v1574_v59 = vld [vmem:[#allocation2] sm:$0xff] }
 0x54e   : > { %1575 = vst.msk [vmem:[%s2709_s10] sm:$0xff] %vm557_vm2, %v1574_v59 }
 0x553   : > { %v1576_v56 = vld [vmem:[#allocation3] sm:$0x1] }
 0x554   : > { %1577 = vst.msk [vmem:[#allocation4] sm:$0x1] %vm1568_vm6, %v1576_v56 }
 0x555 PF: > { %p1945_p6 = scmp.eq.s32.totalorder %s2094_s18, 1  ;;  %s2027_s27 = smov [#allocation4]  }
 0x556   : > { %s1588_s30 = sshll.u32 %s2027_s27, 4  ;;  %s1589_s30 = int_to_ptr.vmem [resolvable:$true] %s1588_s30 }
 0x557   : > { %s1987_s14 = scalar_lea.vmem %s1589_s30, 16  ;;  %s1993_s16 = scalar_lea.vmem %s1589_s30, 32 }
 0x558   : > { %p1988_p7 = scmp.ne.s32.totalorder %s1589_s30, %s1987_s14  ;;  %p1994_p10 = scmp.lt.s32.totalorder %s1589_s30, %s1589_s30 }
 0x559   : > { %p1995_p11 = scmp.lt.s32.totalorder %s1993_s16, %s1987_s14 }
 0x55a   : > { %p1989_p8 = pnand %p1988_p7, %p1945_p6 }
 0x55b   : > { %p1996_p12 = por %p1995_p11, %p1994_p10 }
 0x55c   : > { %p1990_p9 = pneg %p1989_p8 }
 0x55e   : > { %p1997_p13 = pnand %p1996_p12, %p1990_p9 }
 0x560   : > { %2000 = shalt.err (!%p1997_p13)
}
 0x561   : > { %1942 = dma.vmem_to_hbm [thread:$0]  (%p1945_p6), %s1589_s30, 16, %s2710_s11, [#allocation5]  }
 0x562   : > { %2016 = dma.done.wait (%p1945_p6), [#allocation5], 16  }
 0x563   : > { %2018 = vsyncadd (%p1945_p6), [#allocation5], 4294967280 }
 0x564 PF: > { %s2719_s25 = sld [smem:[#allocation7_spill]] }
 0x56a   : > { %s23_s17 = sadd.s32 1, %s2719_s25  }
 0x56b   : > { %p20_p0 = scmp.ge.s32.totalorder %s23_s17, 4  }
 0x56d   :  { %22 = sbr.rel (!%p20_p0) target bundleno = 5 (0x5), region = 127 }
 0x572   :  { %1604 = vsyncpa [#allocation5], 1 }
 0x573   :  { %1606 = vsyncpa [#allocation5 + $0x1], 1 }

</bundles_post_ra>
